<compile_context>
chip_gen: v7x
topology: tpu7x:2x2x1
jax: 0.10.0
libtpu: 0.0.40
codegen_flags: <defaults>
</compile_context>

<pallas_src>
import math

import jax
import jax.numpy as jnp
from jax.experimental import pallas as pl
from jax.experimental.pallas import tpu as pltpu


# ----------------------------------------------------------------------------
# shared math helpers (used both inside the kernel and in the pure-JAX reference)
# ----------------------------------------------------------------------------
# f32 erf: the same rational approximation XLA uses on TPU (ErfImpl32), built only
# from mul/add/div/clamp so it lowers cleanly in Mosaic.
_ERF_ALPHA = (0.00022905065861350646, 0.0034082910107109506, 0.050955695062380861,
              0.18520832239976145, 1.128379143519084)
_ERF_BETA = (-1.1791602954361697e-07, 2.3547966471313185e-05, 0.0010179625278914885,
             0.014070470171167667, 0.11098505178285362, 0.49746925110067538, 1.0)


def _poly(x, coeffs):
    p = jnp.full_like(x, coeffs[0])
    for c in coeffs[1:]:
        p = p * x + c
    return p


def _erf(x):
    x = jnp.clip(x, -3.832506856900711, 3.832506856900711)
    x2 = x * x
    return (x * _poly(x2, _ERF_ALPHA)) / _poly(x2, _ERF_BETA)


def _gelu_exact(x):  # nn.GELU() default (approximate='none')
    return 0.5 * x * (1.0 + _erf(x * (1.0 / math.sqrt(2.0))))


def _layer_norm(x, g, b, eps=1e-5):  # nn.LayerNorm over last dim, biased variance
    mu = jnp.mean(x, axis=-1, keepdims=True)
    var = jnp.mean(jnp.square(x - mu), axis=-1, keepdims=True)
    return (x - mu) * jax.lax.rsqrt(var + eps) * g + b


# row indices inside the stacked (16, F) parameter-vector array
(_IN_G, _IN_B, _VAL_G, _VAL_B, _QRY_G, _QRY_B, _QGATE, _KGATE, _VSCALE,
 _QL_B, _AQN_G, _AQN_B, _FEED_G, _FEED_B, _OUT_G, _OUT_B) = range(16)
_N_VEC_F = 16


# ----------------------------------------------------------------------------
# Pallas kernel
# ----------------------------------------------------------------------------
def _arn_block_kernel(
    x_ref,            # (B, T, F)      VMEM
    vecf_ref,         # (16, F)        VMEM   stacked (1,F) params (gates pre-folded)
    vec4_ref,         # (2, 4F)        VMEM   [lstm_bias (=b_ih+b_hh), proj_b]
    w4_ref,           # (3, F, 4F)     VMEM   [w_ih^T, w_hh^T, proj_w^T]
    qlw_ref,          # (F, F)         VMEM   query_linear weight^T
    conv_w_ref,       # (Co, C)        SMEM   1x1 conv scalars
    conv_b_ref,       # (Co,)          SMEM
    o_ref,            # (B, T, F)      VMEM
    lstm_scr,         # (B, T, F)      VMEM scratch for LSTM outputs
):
    B, T, F = x_ref.shape
    BT = B * T
    f32 = jnp.float32

    # ---- unpack consolidated parameters ----
    vp = vecf_ref[...]

    def vrow(i):
        return vp[i:i + 1, :]

    v4 = vec4_ref[...]
    lstm_bias = v4[0:1, :]                      # b_ih + b_hh, pre-summed in wrapper
    proj_b = v4[1:2, :]

    wm4 = w4_ref[...]
    w_ih, w_hh, proj_w = wm4[0], wm4[1], wm4[2]   # each (F, 4F), pre-transposed
    ql_w = qlw_ref[...]                           # (F, F), pre-transposed

    # ---- input LayerNorm, flat batch-major (B*T, F) layout ----
    x = x_ref[...].astype(f32).reshape(BT, F)               # leading-dim fold (free)
    xn = _layer_norm(x, vrow(_IN_G), vrow(_IN_B))

    # ---- unidirectional single-layer LSTM (batch_first, hidden = F) ----
    # Hoisted input projection: one (B*T,F)x(F,4F) MXU matmul instead of T tiny ones.
    gx = jnp.dot(xn, w_ih, preferred_element_type=f32) + lstm_bias      # (BT, 4F)
    gx3 = gx.reshape(B, T, 4 * F)     # free, tile-aligned unfold; [:, t, :] per step

    h = jnp.zeros((B, F), f32)
    c = jnp.zeros((B, F), f32)
    for t in range(T):                           # fully unrolled: T is static & small
        gates = gx3[:, t, :] + jnp.dot(h, w_hh, preferred_element_type=f32)  # (B,4F)
        # Full-width activations (2 EUP pushes), then cheap static lane slices.
        sg = jax.nn.sigmoid(gates)
        tg = jnp.tanh(gates)
        i_g = sg[:, 0 * F:1 * F]                 # PyTorch gate order i, f, g, o
        f_g = sg[:, 1 * F:2 * F]
        o_g = sg[:, 3 * F:4 * F]
        g_g = tg[:, 2 * F:3 * F]
        c = f_g * c + i_g * g_g
        h = o_g * jnp.tanh(c)
        lstm_scr[:, t, :] = h                    # off the recurrence critical path
    lstm_flat = lstm_scr[...].reshape(BT, F)     # single bulk load, free reshape

    # ---- value / query LayerNorms (ArnBlock level) ----
    value_f = _layer_norm(lstm_flat, vrow(_VAL_G), vrow(_VAL_B))
    query_f = _layer_norm(lstm_flat, vrow(_QRY_G), vrow(_QRY_B))

    # ---- AttnBlock (infer=False, causal=True); parameter-only gates precomputed ----
    q_f = jnp.dot(query_f, ql_w, preferred_element_type=f32) + vrow(_QL_B)
    q_f = _layer_norm(q_f, vrow(_AQN_G), vrow(_AQN_B)) * vrow(_QGATE)  # incl 1/sqrt(F)
    key_f = value_f * vrow(_KGATE)
    val2_f = value_f * vrow(_VSCALE)

    q3 = q_f.reshape(B, T, F)
    k3 = key_f.reshape(B, T, F)
    v3 = val2_f.reshape(B, T, F)
    w = jnp.einsum('btf,bsf->bts', q3, k3, preferred_element_type=f32)    # (B, T, T)
    row = jax.lax.broadcasted_iota(jnp.int32, (T, T), 0)
    col = jax.lax.broadcasted_iota(jnp.int32, (T, T), 1)
    w = jnp.where((col > row)[None, :, :], -jnp.inf, w)        # strictly-upper mask
    w = w - jnp.max(w, axis=-1, keepdims=True)
    e = jnp.exp(w)
    p = e * pl.reciprocal(jnp.sum(e, axis=-1, keepdims=True), approx=True)
    attn_f = jnp.einsum('bts,bsf->btf', p, v3,
                        preferred_element_type=f32).reshape(BT, F)

    out_f = query_f + attn_f
    feed_f = _layer_norm(out_f, vrow(_FEED_G), vrow(_FEED_B))
    outn_f = _layer_norm(out_f, vrow(_OUT_G), vrow(_OUT_B))

    # ---- FeedForward ----
    # 1x1 Conv2d over the channel(=batch) dim.  Co*C is tiny (channel==B), so a couple
    # of SMEM-scalar multiply-adds beat a matmul that would need a lane<->sublane
    # relayout of feed_in into (C, T*F).
    Co, C = conv_w_ref.shape
    halves = []
    for o in range(Co):
        acc = jnp.zeros((T, F), f32) + conv_b_ref[o]
        for cc in range(C):
            acc = acc + conv_w_ref[o, cc] * feed_f[cc * T:(cc + 1) * T, :]
        halves.append(acc)
    half_f = halves[0] if Co == 1 else jnp.concatenate(halves, axis=0)   # (Co*T, F)

    # TODO(synk): cast MXU operands to bf16 (keeping f32 accumulation) once rows are
    # batched on v6e/v7x; at the current latency-bound size f32 keeps extra margin.
    proj = jnp.dot(half_f, proj_w, preferred_element_type=f32) + proj_b  # (Co*T, 4F)
    proj = _gelu_exact(proj)
    # nn.Dropout(0.05) in eval mode is the identity.
    feed_out_f = (proj[:, 0 * F:1 * F] + proj[:, 1 * F:2 * F]
                  + proj[:, 2 * F:3 * F] + proj[:, 3 * F:4 * F] + half_f)

    y3 = outn_f.reshape(B, T, F) + feed_out_f.reshape(Co, T, F)   # Co==1 broadcasts
    o_ref[...] = y3.astype(o_ref.dtype)


# ----------------------------------------------------------------------------
# wrapper
# ----------------------------------------------------------------------------
def arn_block_pallas(x, params):
    B, T, F = x.shape
    p = params
    Co, C = p['conv_w'].shape
    # Same constraints PyTorch implicitly imposes: the 3-D feed-forward input is an
    # un-batched Conv2d image (channels == B), and the final residual broadcast
    # needs Co == 1 (or Co == B).
    assert C == B and Co in (1, B)

    # ---- parameter-only math hoisted out of the kernel (input-independent) ----
    q_gate = jax.nn.sigmoid(p['q_vec']) * (1.0 / math.sqrt(F))            # (1, F)
    k_gate = jax.nn.sigmoid(p['k_vec'])                                   # (1, F)
    vv = jax.nn.sigmoid(p['v_vec'])
    v_scale = (jax.nn.sigmoid(vv @ p['vls_w_t'] + p['vls_b'])
               * jnp.tanh(vv @ p['vlt_w_t'] + p['vlt_b']))                # (1, F)

    # ---- consolidate the many tiny parameter tensors into 4 stacked VMEM inputs ----
    vecf = jnp.concatenate([
        p['in_ln_g'], p['in_ln_b'],
        p['val_ln_g'], p['val_ln_b'], p['qry_ln_g'], p['qry_ln_b'],
        q_gate, k_gate, v_scale,
        p['ql_b'], p['attn_qn_g'], p['attn_qn_b'],
        p['feed_ln_g'], p['feed_ln_b'], p['out_ln_g'], p['out_ln_b'],
    ], axis=0)                                                   # (16, F)
    assert vecf.shape[0] == _N_VEC_F
    vec4 = jnp.concatenate([p['b_ih'] + p['b_hh'], p['proj_b']], axis=0)   # (2, 4F)
    w4 = jnp.stack([p['w_ih_t'], p['w_hh_t'], p['proj_w_t']], axis=0)      # (3, F, 4F)

    vmem_inputs = [x, vecf, vec4, w4, p['ql_w_t']]
    smem_inputs = [p['conv_w'], p['conv_b']]
    in_specs = (
        [pl.BlockSpec(memory_space=pltpu.MemorySpace.VMEM) for _ in vmem_inputs]
        + [pl.BlockSpec(memory_space=pltpu.MemorySpace.SMEM) for _ in smem_inputs]
    )

    # TODO(synk): in the full model, batch many independent ArnBlock instances /
    # frequency bands along a leading grid axis with
    # CompilerParams(dimension_semantics=("parallel",)) (uses both v7x TensorCores,
    # amortizes the ~0.35us invocation overhead), flash-tile the attention over the
    # key axis and convert the unrolled LSTM to a fori_loop for large T.
    y = pl.pallas_call(
        _arn_block_kernel,
        out_shape=jax.ShapeDtypeStruct((B, T, F), jnp.float32),
        in_specs=in_specs,
        out_specs=pl.BlockSpec(memory_space=pltpu.MemorySpace.VMEM),
        scratch_shapes=[pltpu.VMEM((B, T, F), jnp.float32)],
    )(*(vmem_inputs + smem_inputs))
    return y


# ----------------------------------------------------------------------------
# deterministic parameter init (synthetic; shapes follow the PyTorch module)
# ----------------------------------------------------------------------------
def init_params(key, F, C):
    keys = iter(jax.random.split(key, 40))

    def u(shape, stdv):
        return jax.random.uniform(next(keys), shape, jnp.float32, -stdv, stdv)

    def ln():
        return 1.0 + 0.1 * u((1, F), 1.0), 0.1 * u((1, F), 1.0)

    s_lin = 1.0 / math.sqrt(F)
    s_lstm = 1.0 / math.sqrt(F)          # hidden_size == F (causal=True)
    s_conv = 1.0 / math.sqrt(C)          # fan_in = C * 1 * 1

    in_ln_g, in_ln_b = ln()
    val_ln_g, val_ln_b = ln()
    qry_ln_g, qry_ln_b = ln()
    attn_qn_g, attn_qn_b = ln()
    feed_ln_g, feed_ln_b = ln()
    out_ln_g, out_ln_b = ln()

    return dict(
        in_ln_g=in_ln_g, in_ln_b=in_ln_b,
        # LSTM weights stored pre-transposed: (F, 4F); PyTorch gate order i,f,g,o.
        w_ih_t=u((F, 4 * F), s_lstm), w_hh_t=u((F, 4 * F), s_lstm),
        b_ih=u((1, 4 * F), s_lstm), b_hh=u((1, 4 * F), s_lstm),
        val_ln_g=val_ln_g, val_ln_b=val_ln_b,
        qry_ln_g=qry_ln_g, qry_ln_b=qry_ln_b,
        q_vec=u((1, F), s_lin), k_vec=u((1, F), s_lin), v_vec=u((1, F), s_lin),
        ql_w_t=u((F, F), s_lin), ql_b=u((1, F), s_lin),
        attn_qn_g=attn_qn_g, attn_qn_b=attn_qn_b,
        vls_w_t=u((F, F), s_lin), vls_b=u((1, F), s_lin),
        vlt_w_t=u((F, F), s_lin), vlt_b=u((1, F), s_lin),
        feed_ln_g=feed_ln_g, feed_ln_b=feed_ln_b,
        out_ln_g=out_ln_g, out_ln_b=out_ln_b,
        proj_w_t=u((F, 4 * F), s_lin), proj_b=u((1, 4 * F), s_lin),
        conv_w=u((C // 2, C), s_conv), conv_b=u((C // 2,), s_conv),
    )


# ----------------------------------------------------------------------------
# pure-JAX reference (for a sanity check)
# ----------------------------------------------------------------------------
def arn_block_reference(x, p):
    B, T, F = x.shape
    xn = _layer_norm(x, p['in_ln_g'], p['in_ln_b'])

    def cell(carry, x_t):
        h, c = carry
        gates = x_t @ p['w_ih_t'] + h @ p['w_hh_t'] + p['b_ih'] + p['b_hh']
        i_g = jax.nn.sigmoid(gates[:, 0 * F:1 * F])
        f_g = jax.nn.sigmoid(gates[:, 1 * F:2 * F])
        g_g = jnp.tanh(gates[:, 2 * F:3 * F])
        o_g = jax.nn.sigmoid(gates[:, 3 * F:4 * F])
        c_new = f_g * c + i_g * g_g
        h_new = o_g * jnp.tanh(c_new)
        return (h_new, c_new), h_new

    _, hs = jax.lax.scan(cell, (jnp.zeros((B, F)), jnp.zeros((B, F))),
                         jnp.swapaxes(xn, 0, 1))
    lstm_out = jnp.swapaxes(hs, 0, 1)

    value = _layer_norm(lstm_out, p['val_ln_g'], p['val_ln_b'])
    query = _layer_norm(lstm_out, p['qry_ln_g'], p['qry_ln_b'])

    q = query @ p['ql_w_t'] + p['ql_b']
    q = _layer_norm(q, p['attn_qn_g'], p['attn_qn_b'])
    q = q * jax.nn.sigmoid(p['q_vec'])
    key = value * jax.nn.sigmoid(p['k_vec'])
    v_vec = jax.nn.sigmoid(p['v_vec'])
    v_sigm = jax.nn.sigmoid(v_vec @ p['vls_w_t'] + p['vls_b'])
    v_tanh = jnp.tanh(v_vec @ p['vlt_w_t'] + p['vlt_b'])
    val2 = value * (v_sigm * v_tanh)

    w = jnp.einsum('btf,bsf->bts', q, key / math.sqrt(F))
    mask = jnp.triu(jnp.ones((T, T), bool), k=1)[None]
    w = jnp.where(mask, -jnp.inf, w)
    w = jax.nn.softmax(w, axis=-1)
    attn_out = jnp.einsum('bts,bsf->btf', w, val2)

    out = query + attn_out
    feed_in = _layer_norm(out, p['feed_ln_g'], p['feed_ln_b'])
    out_n = _layer_norm(out, p['out_ln_g'], p['out_ln_b'])

    half = jnp.einsum('oc,ctf->otf', p['conv_w'], feed_in) + p['conv_b'][:, None, None]
    proj = _gelu_exact(half @ p['proj_w_t'] + p['proj_b'])
    feed_out = (proj[..., 0 * F:1 * F] + proj[..., 1 * F:2 * F]
                + proj[..., 2 * F:3 * F] + proj[..., 3 * F:4 * F] + half)
    return out_n + feed_out


if __name__ == "__main__":
    B, T, F, C = 2, 8, 32, 2      # batch must equal `channel` (see layout comment)
    key = jax.random.PRNGKey(0)
    kx, kp = jax.random.split(key)
    x = jax.random.normal(kx, (B, T, F), jnp.float32)
    params = init_params(kp, F, C)

    out = arn_block_pallas(x, params)
    out = jax.block_until_ready(out)
    assert out.shape == (B, T, F)

    ref = arn_block_reference(x, params)
    max_diff = float(jnp.max(jnp.abs(out - ref)))
    if not bool(jnp.allclose(out, ref, atol=1e-2, rtol=1e-2)):
        raise AssertionError(f"kernel/reference mismatch, max abs diff = {max_diff}")

    print("KERNEL_OK")
</pallas_src>

<mosaic_0001>
module attributes {stable_mosaic.version = 11 : i64} {
  func.func @_arn_block_kernel(%arg0: memref<2x8x32xf32, #tpu.memory_space<vmem>>, %arg1: memref<16x32xf32, #tpu.memory_space<vmem>>, %arg2: memref<2x128xf32, #tpu.memory_space<vmem>>, %arg3: memref<3x32x128xf32, #tpu.memory_space<vmem>>, %arg4: memref<32x32xf32, #tpu.memory_space<vmem>>, %arg5: memref<1x2xf32, #tpu.memory_space<smem>>, %arg6: memref<1xf32, #tpu.memory_space<smem>>, %arg7: memref<2x8x32xf32, #tpu.memory_space<vmem>>, %arg8: memref<2x8x32xf32, #tpu.memory_space<vmem>>) attributes {dimension_semantics = [], scalar_prefetch = 0 : i64, scratch_operands = 1 : i64, tpu.core_type = #tpu.core_type<tc>} {
    %c0 = arith.constant 0 : index
    %c0_0 = arith.constant 0 : index
    %0 = vector.load %arg1[%c0, %c0_0] : memref<16x32xf32, #tpu.memory_space<vmem>>, vector<16x32xf32>
    %c0_1 = arith.constant 0 : index
    %c0_2 = arith.constant 0 : index
    %1 = vector.load %arg2[%c0_1, %c0_2] : memref<2x128xf32, #tpu.memory_space<vmem>>, vector<2x128xf32>
    %2 = vector.extract_strided_slice %1 {offsets = [0, 0], sizes = [1, 128], strides = [1, 1]} : vector<2x128xf32> to vector<1x128xf32>
    %3 = vector.extract_strided_slice %1 {offsets = [1, 0], sizes = [1, 128], strides = [1, 1]} : vector<2x128xf32> to vector<1x128xf32>
    %c0_3 = arith.constant 0 : index
    %c0_4 = arith.constant 0 : index
    %c0_5 = arith.constant 0 : index
    %4 = vector.load %arg3[%c0_3, %c0_4, %c0_5] : memref<3x32x128xf32, #tpu.memory_space<vmem>>, vector<3x32x128xf32>
    %5 = vector.extract_strided_slice %4 {offsets = [0, 0, 0], sizes = [1, 32, 128], strides = [1, 1, 1]} : vector<3x32x128xf32> to vector<1x32x128xf32>
    %6 = vector.shape_cast %5 : vector<1x32x128xf32> to vector<32x128xf32>
    %7 = vector.extract_strided_slice %4 {offsets = [1, 0, 0], sizes = [1, 32, 128], strides = [1, 1, 1]} : vector<3x32x128xf32> to vector<1x32x128xf32>
    %8 = vector.shape_cast %7 : vector<1x32x128xf32> to vector<32x128xf32>
    %9 = vector.extract_strided_slice %4 {offsets = [2, 0, 0], sizes = [1, 32, 128], strides = [1, 1, 1]} : vector<3x32x128xf32> to vector<1x32x128xf32>
    %10 = vector.shape_cast %9 : vector<1x32x128xf32> to vector<32x128xf32>
    %c0_6 = arith.constant 0 : index
    %c0_7 = arith.constant 0 : index
    %11 = vector.load %arg4[%c0_6, %c0_7] : memref<32x32xf32, #tpu.memory_space<vmem>>, vector<32x32xf32>
    %c0_8 = arith.constant 0 : index
    %c0_9 = arith.constant 0 : index
    %c0_10 = arith.constant 0 : index
    %12 = vector.load %arg0[%c0_8, %c0_9, %c0_10] : memref<2x8x32xf32, #tpu.memory_space<vmem>>, vector<2x8x32xf32>
    %13 = vector.shape_cast %12 : vector<2x8x32xf32> to vector<16x32xf32>
    %14 = vector.extract_strided_slice %0 {offsets = [0, 0], sizes = [1, 32], strides = [1, 1]} : vector<16x32xf32> to vector<1x32xf32>
    %15 = vector.extract_strided_slice %0 {offsets = [1, 0], sizes = [1, 32], strides = [1, 1]} : vector<16x32xf32> to vector<1x32xf32>
    %cst = arith.constant dense<0.000000e+00> : vector<16xf32>
    %16 = vector.multi_reduction <add>, %13, %cst [1] : vector<16x32xf32> to vector<16xf32>
    %17 = vector.shape_cast %16 : vector<16xf32> to vector<16x1xf32>
    %cst_11 = arith.constant 3.200000e+01 : f32
    %18 = vector.broadcast %cst_11 : f32 to vector<16x1xf32>
    %19 = arith.divf %17, %18 : vector<16x1xf32>
    %20 = vector.broadcast %19 : vector<16x1xf32> to vector<16x32xf32>
    %21 = arith.subf %13, %20 : vector<16x32xf32>
    %22 = arith.mulf %21, %21 : vector<16x32xf32>
    %cst_12 = arith.constant dense<0.000000e+00> : vector<16xf32>
    %23 = vector.multi_reduction <add>, %22, %cst_12 [1] : vector<16x32xf32> to vector<16xf32>
    %24 = vector.shape_cast %23 : vector<16xf32> to vector<16x1xf32>
    %cst_13 = arith.constant 3.200000e+01 : f32
    %25 = vector.broadcast %cst_13 : f32 to vector<16x1xf32>
    %26 = arith.divf %24, %25 : vector<16x1xf32>
    %27 = vector.broadcast %19 : vector<16x1xf32> to vector<16x32xf32>
    %28 = arith.subf %13, %27 : vector<16x32xf32>
    %cst_14 = arith.constant 9.99999974E-6 : f32
    %29 = vector.broadcast %cst_14 : f32 to vector<16x1xf32>
    %30 = arith.addf %26, %29 : vector<16x1xf32>
    %31 = math.rsqrt %30 : vector<16x1xf32>
    %32 = vector.broadcast %31 : vector<16x1xf32> to vector<16x32xf32>
    %33 = arith.mulf %28, %32 : vector<16x32xf32>
    %34 = vector.broadcast %14 : vector<1x32xf32> to vector<16x32xf32>
    %35 = arith.mulf %33, %34 : vector<16x32xf32>
    %36 = vector.broadcast %15 : vector<1x32xf32> to vector<16x32xf32>
    %37 = arith.addf %35, %36 : vector<16x32xf32>
    %cst_15 = arith.constant dense<0.000000e+00> : vector<16x128xf32>
    %38 = tpu.matmul %37, %6, %cst_15 {dimension_numbers = #tpu.dot_dimension_numbers<[1], [0], [0], [1], [0, 0, 1, 1], [], []>} : vector<16x32xf32>, vector<32x128xf32>, vector<16x128xf32> -> vector<16x128xf32>
    %39 = vector.broadcast %2 : vector<1x128xf32> to vector<16x128xf32>
    %40 = arith.addf %38, %39 : vector<16x128xf32>
    %41 = vector.shape_cast %40 : vector<16x128xf32> to vector<2x8x128xf32>
    %cst_16 = arith.constant 0.000000e+00 : f32
    %42 = vector.broadcast %cst_16 : f32 to vector<2x32xf32>
    %cst_17 = arith.constant 0.000000e+00 : f32
    %43 = vector.broadcast %cst_17 : f32 to vector<2x32xf32>
    %44 = vector.extract_strided_slice %41 {offsets = [0, 0, 0], sizes = [2, 1, 128], strides = [1, 1, 1]} : vector<2x8x128xf32> to vector<2x1x128xf32>
    %45 = vector.shape_cast %44 : vector<2x1x128xf32> to vector<2x128xf32>
    %cst_18 = arith.constant dense<0.000000e+00> : vector<2x128xf32>
    %46 = tpu.matmul %42, %8, %cst_18 {dimension_numbers = #tpu.dot_dimension_numbers<[1], [0], [0], [1], [0, 0, 1, 1], [], []>} : vector<2x32xf32>, vector<32x128xf32>, vector<2x128xf32> -> vector<2x128xf32>
    %47 = arith.addf %45, %46 : vector<2x128xf32>
    %48 = arith.negf %47 : vector<2x128xf32>
    %49 = math.exp %48 : vector<2x128xf32>
    %cst_19 = arith.constant 1.000000e+00 : f32
    %50 = vector.broadcast %cst_19 : f32 to vector<2x128xf32>
    %51 = arith.addf %50, %49 : vector<2x128xf32>
    %52 = arith.divf %50, %51 : vector<2x128xf32>
    %53 = math.tanh %47 : vector<2x128xf32>
    %54 = vector.extract_strided_slice %52 {offsets = [0, 0], sizes = [2, 32], strides = [1, 1]} : vector<2x128xf32> to vector<2x32xf32>
    %55 = vector.extract_strided_slice %52 {offsets = [0, 32], sizes = [2, 32], strides = [1, 1]} : vector<2x128xf32> to vector<2x32xf32>
    %56 = vector.extract_strided_slice %52 {offsets = [0, 96], sizes = [2, 32], strides = [1, 1]} : vector<2x128xf32> to vector<2x32xf32>
    %57 = vector.extract_strided_slice %53 {offsets = [0, 64], sizes = [2, 32], strides = [1, 1]} : vector<2x128xf32> to vector<2x32xf32>
    %58 = arith.mulf %55, %43 : vector<2x32xf32>
    %59 = arith.mulf %54, %57 : vector<2x32xf32>
    %60 = arith.addf %58, %59 : vector<2x32xf32>
    %61 = math.tanh %60 : vector<2x32xf32>
    %62 = arith.mulf %56, %61 : vector<2x32xf32>
    %c0_20 = arith.constant 0 : index
    %c0_21 = arith.constant 0 : index
    %c0_22 = arith.constant 0 : index
    %63 = vector.load %arg8[%c0_20, %c0_21, %c0_22] : memref<2x8x32xf32, #tpu.memory_space<vmem>>, vector<2x1x32xf32>
    %64 = vector.shape_cast %63 : vector<2x1x32xf32> to vector<2x32xf32>
    %65 = vector.shape_cast %62 : vector<2x32xf32> to vector<2x1x32xf32>
    tpu.vector_store %arg8[%c0_20, %c0_21, %c0_22], %65 {strides = array<i32>} : memref<2x8x32xf32, #tpu.memory_space<vmem>>, vector<2x1x32xf32>,
    %66 = vector.extract_strided_slice %41 {offsets = [0, 1, 0], sizes = [2, 1, 128], strides = [1, 1, 1]} : vector<2x8x128xf32> to vector<2x1x128xf32>
    %67 = vector.shape_cast %66 : vector<2x1x128xf32> to vector<2x128xf32>
    %cst_23 = arith.constant dense<0.000000e+00> : vector<2x128xf32>
    %68 = tpu.matmul %62, %8, %cst_23 {dimension_numbers = #tpu.dot_dimension_numbers<[1], [0], [0], [1], [0, 0, 1, 1], [], []>} : vector<2x32xf32>, vector<32x128xf32>, vector<2x128xf32> -> vector<2x128xf32>
    %69 = arith.addf %67, %68 : vector<2x128xf32>
    %70 = arith.negf %69 : vector<2x128xf32>
    %71 = math.exp %70 : vector<2x128xf32>
    %cst_24 = arith.constant 1.000000e+00 : f32
    %72 = vector.broadcast %cst_24 : f32 to vector<2x128xf32>
    %73 = arith.addf %72, %71 : vector<2x128xf32>
    %74 = arith.divf %72, %73 : vector<2x128xf32>
    %75 = math.tanh %69 : vector<2x128xf32>
    %76 = vector.extract_strided_slice %74 {offsets = [0, 0], sizes = [2, 32], strides = [1, 1]} : vector<2x128xf32> to vector<2x32xf32>
    %77 = vector.extract_strided_slice %74 {offsets = [0, 32], sizes = [2, 32], strides = [1, 1]} : vector<2x128xf32> to vector<2x32xf32>
    %78 = vector.extract_strided_slice %74 {offsets = [0, 96], sizes = [2, 32], strides = [1, 1]} : vector<2x128xf32> to vector<2x32xf32>
    %79 = vector.extract_strided_slice %75 {offsets = [0, 64], sizes = [2, 32], strides = [1, 1]} : vector<2x128xf32> to vector<2x32xf32>
    %80 = arith.mulf %77, %60 : vector<2x32xf32>
    %81 = arith.mulf %76, %79 : vector<2x32xf32>
    %82 = arith.addf %80, %81 : vector<2x32xf32>
    %83 = math.tanh %82 : vector<2x32xf32>
    %84 = arith.mulf %78, %83 : vector<2x32xf32>
    %c0_25 = arith.constant 0 : index
    %c1 = arith.constant 1 : index
    %c0_26 = arith.constant 0 : index
    %85 = vector.load %arg8[%c0_25, %c1, %c0_26] : memref<2x8x32xf32, #tpu.memory_space<vmem>>, vector<2x1x32xf32>
    %86 = vector.shape_cast %85 : vector<2x1x32xf32> to vector<2x32xf32>
    %87 = vector.shape_cast %84 : vector<2x32xf32> to vector<2x1x32xf32>
    tpu.vector_store %arg8[%c0_25, %c1, %c0_26], %87 {strides = array<i32>} : memref<2x8x32xf32, #tpu.memory_space<vmem>>, vector<2x1x32xf32>,
    %88 = vector.extract_strided_slice %41 {offsets = [0, 2, 0], sizes = [2, 1, 128], strides = [1, 1, 1]} : vector<2x8x128xf32> to vector<2x1x128xf32>
    %89 = vector.shape_cast %88 : vector<2x1x128xf32> to vector<2x128xf32>
    %cst_27 = arith.constant dense<0.000000e+00> : vector<2x128xf32>
    %90 = tpu.matmul %84, %8, %cst_27 {dimension_numbers = #tpu.dot_dimension_numbers<[1], [0], [0], [1], [0, 0, 1, 1], [], []>} : vector<2x32xf32>, vector<32x128xf32>, vector<2x128xf32> -> vector<2x128xf32>
    %91 = arith.addf %89, %90 : vector<2x128xf32>
    %92 = arith.negf %91 : vector<2x128xf32>
    %93 = math.exp %92 : vector<2x128xf32>
    %cst_28 = arith.constant 1.000000e+00 : f32
    %94 = vector.broadcast %cst_28 : f32 to vector<2x128xf32>
    %95 = arith.addf %94, %93 : vector<2x128xf32>
    %96 = arith.divf %94, %95 : vector<2x128xf32>
    %97 = math.tanh %91 : vector<2x128xf32>
    %98 = vector.extract_strided_slice %96 {offsets = [0, 0], sizes = [2, 32], strides = [1, 1]} : vector<2x128xf32> to vector<2x32xf32>
    %99 = vector.extract_strided_slice %96 {offsets = [0, 32], sizes = [2, 32], strides = [1, 1]} : vector<2x128xf32> to vector<2x32xf32>
    %100 = vector.extract_strided_slice %96 {offsets = [0, 96], sizes = [2, 32], strides = [1, 1]} : vector<2x128xf32> to vector<2x32xf32>
    %101 = vector.extract_strided_slice %97 {offsets = [0, 64], sizes = [2, 32], strides = [1, 1]} : vector<2x128xf32> to vector<2x32xf32>
    %102 = arith.mulf %99, %82 : vector<2x32xf32>
    %103 = arith.mulf %98, %101 : vector<2x32xf32>
    %104 = arith.addf %102, %103 : vector<2x32xf32>
    %105 = math.tanh %104 : vector<2x32xf32>
    %106 = arith.mulf %100, %105 : vector<2x32xf32>
    %c0_29 = arith.constant 0 : index
    %c2 = arith.constant 2 : index
    %c0_30 = arith.constant 0 : index
    %107 = vector.load %arg8[%c0_29, %c2, %c0_30] : memref<2x8x32xf32, #tpu.memory_space<vmem>>, vector<2x1x32xf32>
    %108 = vector.shape_cast %107 : vector<2x1x32xf32> to vector<2x32xf32>
    %109 = vector.shape_cast %106 : vector<2x32xf32> to vector<2x1x32xf32>
    tpu.vector_store %arg8[%c0_29, %c2, %c0_30], %109 {strides = array<i32>} : memref<2x8x32xf32, #tpu.memory_space<vmem>>, vector<2x1x32xf32>,
    %110 = vector.extract_strided_slice %41 {offsets = [0, 3, 0], sizes = [2, 1, 128], strides = [1, 1, 1]} : vector<2x8x128xf32> to vector<2x1x128xf32>
    %111 = vector.shape_cast %110 : vector<2x1x128xf32> to vector<2x128xf32>
    %cst_31 = arith.constant dense<0.000000e+00> : vector<2x128xf32>
    %112 = tpu.matmul %106, %8, %cst_31 {dimension_numbers = #tpu.dot_dimension_numbers<[1], [0], [0], [1], [0, 0, 1, 1], [], []>} : vector<2x32xf32>, vector<32x128xf32>, vector<2x128xf32> -> vector<2x128xf32>
    %113 = arith.addf %111, %112 : vector<2x128xf32>
    %114 = arith.negf %113 : vector<2x128xf32>
    %115 = math.exp %114 : vector<2x128xf32>
    %cst_32 = arith.constant 1.000000e+00 : f32
    %116 = vector.broadcast %cst_32 : f32 to vector<2x128xf32>
    %117 = arith.addf %116, %115 : vector<2x128xf32>
    %118 = arith.divf %116, %117 : vector<2x128xf32>
    %119 = math.tanh %113 : vector<2x128xf32>
    %120 = vector.extract_strided_slice %118 {offsets = [0, 0], sizes = [2, 32], strides = [1, 1]} : vector<2x128xf32> to vector<2x32xf32>
    %121 = vector.extract_strided_slice %118 {offsets = [0, 32], sizes = [2, 32], strides = [1, 1]} : vector<2x128xf32> to vector<2x32xf32>
    %122 = vector.extract_strided_slice %118 {offsets = [0, 96], sizes = [2, 32], strides = [1, 1]} : vector<2x128xf32> to vector<2x32xf32>
    %123 = vector.extract_strided_slice %119 {offsets = [0, 64], sizes = [2, 32], strides = [1, 1]} : vector<2x128xf32> to vector<2x32xf32>
    %124 = arith.mulf %121, %104 : vector<2x32xf32>
    %125 = arith.mulf %120, %123 : vector<2x32xf32>
    %126 = arith.addf %124, %125 : vector<2x32xf32>
    %127 = math.tanh %126 : vector<2x32xf32>
    %128 = arith.mulf %122, %127 : vector<2x32xf32>
    %c0_33 = arith.constant 0 : index
    %c3 = arith.constant 3 : index
    %c0_34 = arith.constant 0 : index
    %129 = vector.load %arg8[%c0_33, %c3, %c0_34] : memref<2x8x32xf32, #tpu.memory_space<vmem>>, vector<2x1x32xf32>
    %130 = vector.shape_cast %129 : vector<2x1x32xf32> to vector<2x32xf32>
    %131 = vector.shape_cast %128 : vector<2x32xf32> to vector<2x1x32xf32>
    tpu.vector_store %arg8[%c0_33, %c3, %c0_34], %131 {strides = array<i32>} : memref<2x8x32xf32, #tpu.memory_space<vmem>>, vector<2x1x32xf32>,
    %132 = vector.extract_strided_slice %41 {offsets = [0, 4, 0], sizes = [2, 1, 128], strides = [1, 1, 1]} : vector<2x8x128xf32> to vector<2x1x128xf32>
    %133 = vector.shape_cast %132 : vector<2x1x128xf32> to vector<2x128xf32>
    %cst_35 = arith.constant dense<0.000000e+00> : vector<2x128xf32>
    %134 = tpu.matmul %128, %8, %cst_35 {dimension_numbers = #tpu.dot_dimension_numbers<[1], [0], [0], [1], [0, 0, 1, 1], [], []>} : vector<2x32xf32>, vector<32x128xf32>, vector<2x128xf32> -> vector<2x128xf32>
    %135 = arith.addf %133, %134 : vector<2x128xf32>
    %136 = arith.negf %135 : vector<2x128xf32>
    %137 = math.exp %136 : vector<2x128xf32>
    %cst_36 = arith.constant 1.000000e+00 : f32
    %138 = vector.broadcast %cst_36 : f32 to vector<2x128xf32>
    %139 = arith.addf %138, %137 : vector<2x128xf32>
    %140 = arith.divf %138, %139 : vector<2x128xf32>
    %141 = math.tanh %135 : vector<2x128xf32>
    %142 = vector.extract_strided_slice %140 {offsets = [0, 0], sizes = [2, 32], strides = [1, 1]} : vector<2x128xf32> to vector<2x32xf32>
    %143 = vector.extract_strided_slice %140 {offsets = [0, 32], sizes = [2, 32], strides = [1, 1]} : vector<2x128xf32> to vector<2x32xf32>
    %144 = vector.extract_strided_slice %140 {offsets = [0, 96], sizes = [2, 32], strides = [1, 1]} : vector<2x128xf32> to vector<2x32xf32>
    %145 = vector.extract_strided_slice %141 {offsets = [0, 64], sizes = [2, 32], strides = [1, 1]} : vector<2x128xf32> to vector<2x32xf32>
    %146 = arith.mulf %143, %126 : vector<2x32xf32>
    %147 = arith.mulf %142, %145 : vector<2x32xf32>
    %148 = arith.addf %146, %147 : vector<2x32xf32>
    %149 = math.tanh %148 : vector<2x32xf32>
    %150 = arith.mulf %144, %149 : vector<2x32xf32>
    %c0_37 = arith.constant 0 : index
    %c4 = arith.constant 4 : index
    %c0_38 = arith.constant 0 : index
    %151 = vector.load %arg8[%c0_37, %c4, %c0_38] : memref<2x8x32xf32, #tpu.memory_space<vmem>>, vector<2x1x32xf32>
    %152 = vector.shape_cast %151 : vector<2x1x32xf32> to vector<2x32xf32>
    %153 = vector.shape_cast %150 : vector<2x32xf32> to vector<2x1x32xf32>
    tpu.vector_store %arg8[%c0_37, %c4, %c0_38], %153 {strides = array<i32>} : memref<2x8x32xf32, #tpu.memory_space<vmem>>, vector<2x1x32xf32>,
    %154 = vector.extract_strided_slice %41 {offsets = [0, 5, 0], sizes = [2, 1, 128], strides = [1, 1, 1]} : vector<2x8x128xf32> to vector<2x1x128xf32>
    %155 = vector.shape_cast %154 : vector<2x1x128xf32> to vector<2x128xf32>
    %cst_39 = arith.constant dense<0.000000e+00> : vector<2x128xf32>
    %156 = tpu.matmul %150, %8, %cst_39 {dimension_numbers = #tpu.dot_dimension_numbers<[1], [0], [0], [1], [0, 0, 1, 1], [], []>} : vector<2x32xf32>, vector<32x128xf32>, vector<2x128xf32> -> vector<2x128xf32>
    %157 = arith.addf %155, %156 : vector<2x128xf32>
    %158 = arith.negf %157 : vector<2x128xf32>
    %159 = math.exp %158 : vector<2x128xf32>
    %cst_40 = arith.constant 1.000000e+00 : f32
    %160 = vector.broadcast %cst_40 : f32 to vector<2x128xf32>
    %161 = arith.addf %160, %159 : vector<2x128xf32>
    %162 = arith.divf %160, %161 : vector<2x128xf32>
    %163 = math.tanh %157 : vector<2x128xf32>
    %164 = vector.extract_strided_slice %162 {offsets = [0, 0], sizes = [2, 32], strides = [1, 1]} : vector<2x128xf32> to vector<2x32xf32>
    %165 = vector.extract_strided_slice %162 {offsets = [0, 32], sizes = [2, 32], strides = [1, 1]} : vector<2x128xf32> to vector<2x32xf32>
    %166 = vector.extract_strided_slice %162 {offsets = [0, 96], sizes = [2, 32], strides = [1, 1]} : vector<2x128xf32> to vector<2x32xf32>
    %167 = vector.extract_strided_slice %163 {offsets = [0, 64], sizes = [2, 32], strides = [1, 1]} : vector<2x128xf32> to vector<2x32xf32>
    %168 = arith.mulf %165, %148 : vector<2x32xf32>
    %169 = arith.mulf %164, %167 : vector<2x32xf32>
    %170 = arith.addf %168, %169 : vector<2x32xf32>
    %171 = math.tanh %170 : vector<2x32xf32>
    %172 = arith.mulf %166, %171 : vector<2x32xf32>
    %c0_41 = arith.constant 0 : index
    %c5 = arith.constant 5 : index
    %c0_42 = arith.constant 0 : index
    %173 = vector.load %arg8[%c0_41, %c5, %c0_42] : memref<2x8x32xf32, #tpu.memory_space<vmem>>, vector<2x1x32xf32>
    %174 = vector.shape_cast %173 : vector<2x1x32xf32> to vector<2x32xf32>
    %175 = vector.shape_cast %172 : vector<2x32xf32> to vector<2x1x32xf32>
    tpu.vector_store %arg8[%c0_41, %c5, %c0_42], %175 {strides = array<i32>} : memref<2x8x32xf32, #tpu.memory_space<vmem>>, vector<2x1x32xf32>,
    %176 = vector.extract_strided_slice %41 {offsets = [0, 6, 0], sizes = [2, 1, 128], strides = [1, 1, 1]} : vector<2x8x128xf32> to vector<2x1x128xf32>
    %177 = vector.shape_cast %176 : vector<2x1x128xf32> to vector<2x128xf32>
    %cst_43 = arith.constant dense<0.000000e+00> : vector<2x128xf32>
    %178 = tpu.matmul %172, %8, %cst_43 {dimension_numbers = #tpu.dot_dimension_numbers<[1], [0], [0], [1], [0, 0, 1, 1], [], []>} : vector<2x32xf32>, vector<32x128xf32>, vector<2x128xf32> -> vector<2x128xf32>
    %179 = arith.addf %177, %178 : vector<2x128xf32>
    %180 = arith.negf %179 : vector<2x128xf32>
    %181 = math.exp %180 : vector<2x128xf32>
    %cst_44 = arith.constant 1.000000e+00 : f32
    %182 = vector.broadcast %cst_44 : f32 to vector<2x128xf32>
    %183 = arith.addf %182, %181 : vector<2x128xf32>
    %184 = arith.divf %182, %183 : vector<2x128xf32>
    %185 = math.tanh %179 : vector<2x128xf32>
    %186 = vector.extract_strided_slice %184 {offsets = [0, 0], sizes = [2, 32], strides = [1, 1]} : vector<2x128xf32> to vector<2x32xf32>
    %187 = vector.extract_strided_slice %184 {offsets = [0, 32], sizes = [2, 32], strides = [1, 1]} : vector<2x128xf32> to vector<2x32xf32>
    %188 = vector.extract_strided_slice %184 {offsets = [0, 96], sizes = [2, 32], strides = [1, 1]} : vector<2x128xf32> to vector<2x32xf32>
    %189 = vector.extract_strided_slice %185 {offsets = [0, 64], sizes = [2, 32], strides = [1, 1]} : vector<2x128xf32> to vector<2x32xf32>
    %190 = arith.mulf %187, %170 : vector<2x32xf32>
    %191 = arith.mulf %186, %189 : vector<2x32xf32>
    %192 = arith.addf %190, %191 : vector<2x32xf32>
    %193 = math.tanh %192 : vector<2x32xf32>
    %194 = arith.mulf %188, %193 : vector<2x32xf32>
    %c0_45 = arith.constant 0 : index
    %c6 = arith.constant 6 : index
    %c0_46 = arith.constant 0 : index
    %195 = vector.load %arg8[%c0_45, %c6, %c0_46] : memref<2x8x32xf32, #tpu.memory_space<vmem>>, vector<2x1x32xf32>
    %196 = vector.shape_cast %195 : vector<2x1x32xf32> to vector<2x32xf32>
    %197 = vector.shape_cast %194 : vector<2x32xf32> to vector<2x1x32xf32>
    tpu.vector_store %arg8[%c0_45, %c6, %c0_46], %197 {strides = array<i32>} : memref<2x8x32xf32, #tpu.memory_space<vmem>>, vector<2x1x32xf32>,
    %198 = vector.extract_strided_slice %41 {offsets = [0, 7, 0], sizes = [2, 1, 128], strides = [1, 1, 1]} : vector<2x8x128xf32> to vector<2x1x128xf32>
    %199 = vector.shape_cast %198 : vector<2x1x128xf32> to vector<2x128xf32>
    %cst_47 = arith.constant dense<0.000000e+00> : vector<2x128xf32>
    %200 = tpu.matmul %194, %8, %cst_47 {dimension_numbers = #tpu.dot_dimension_numbers<[1], [0], [0], [1], [0, 0, 1, 1], [], []>} : vector<2x32xf32>, vector<32x128xf32>, vector<2x128xf32> -> vector<2x128xf32>
    %201 = arith.addf %199, %200 : vector<2x128xf32>
    %202 = arith.negf %201 : vector<2x128xf32>
    %203 = math.exp %202 : vector<2x128xf32>
    %cst_48 = arith.constant 1.000000e+00 : f32
    %204 = vector.broadcast %cst_48 : f32 to vector<2x128xf32>
    %205 = arith.addf %204, %203 : vector<2x128xf32>
    %206 = arith.divf %204, %205 : vector<2x128xf32>
    %207 = math.tanh %201 : vector<2x128xf32>
    %208 = vector.extract_strided_slice %206 {offsets = [0, 0], sizes = [2, 32], strides = [1, 1]} : vector<2x128xf32> to vector<2x32xf32>
    %209 = vector.extract_strided_slice %206 {offsets = [0, 32], sizes = [2, 32], strides = [1, 1]} : vector<2x128xf32> to vector<2x32xf32>
    %210 = vector.extract_strided_slice %206 {offsets = [0, 96], sizes = [2, 32], strides = [1, 1]} : vector<2x128xf32> to vector<2x32xf32>
    %211 = vector.extract_strided_slice %207 {offsets = [0, 64], sizes = [2, 32], strides = [1, 1]} : vector<2x128xf32> to vector<2x32xf32>
    %212 = arith.mulf %209, %192 : vector<2x32xf32>
    %213 = arith.mulf %208, %211 : vector<2x32xf32>
    %214 = arith.addf %212, %213 : vector<2x32xf32>
    %215 = math.tanh %214 : vector<2x32xf32>
    %216 = arith.mulf %210, %215 : vector<2x32xf32>
    %c0_49 = arith.constant 0 : index
    %c7 = arith.constant 7 : index
    %c0_50 = arith.constant 0 : index
    %217 = vector.load %arg8[%c0_49, %c7, %c0_50] : memref<2x8x32xf32, #tpu.memory_space<vmem>>, vector<2x1x32xf32>
    %218 = vector.shape_cast %217 : vector<2x1x32xf32> to vector<2x32xf32>
    %219 = vector.shape_cast %216 : vector<2x32xf32> to vector<2x1x32xf32>
    tpu.vector_store %arg8[%c0_49, %c7, %c0_50], %219 {strides = array<i32>} : memref<2x8x32xf32, #tpu.memory_space<vmem>>, vector<2x1x32xf32>,
    %c0_51 = arith.constant 0 : index
    %c0_52 = arith.constant 0 : index
    %c0_53 = arith.constant 0 : index
    %220 = vector.load %arg8[%c0_51, %c0_52, %c0_53] : memref<2x8x32xf32, #tpu.memory_space<vmem>>, vector<2x8x32xf32>
    %221 = vector.shape_cast %220 : vector<2x8x32xf32> to vector<16x32xf32>
    %222 = vector.extract_strided_slice %0 {offsets = [2, 0], sizes = [1, 32], strides = [1, 1]} : vector<16x32xf32> to vector<1x32xf32>
    %223 = vector.extract_strided_slice %0 {offsets = [3, 0], sizes = [1, 32], strides = [1, 1]} : vector<16x32xf32> to vector<1x32xf32>
    %cst_54 = arith.constant dense<0.000000e+00> : vector<16xf32>
    %224 = vector.multi_reduction <add>, %221, %cst_54 [1] : vector<16x32xf32> to vector<16xf32>
    %225 = vector.shape_cast %224 : vector<16xf32> to vector<16x1xf32>
    %cst_55 = arith.constant 3.200000e+01 : f32
    %226 = vector.broadcast %cst_55 : f32 to vector<16x1xf32>
    %227 = arith.divf %225, %226 : vector<16x1xf32>
    %228 = vector.broadcast %227 : vector<16x1xf32> to vector<16x32xf32>
    %229 = arith.subf %221, %228 : vector<16x32xf32>
    %230 = arith.mulf %229, %229 : vector<16x32xf32>
    %cst_56 = arith.constant dense<0.000000e+00> : vector<16xf32>
    %231 = vector.multi_reduction <add>, %230, %cst_56 [1] : vector<16x32xf32> to vector<16xf32>
    %232 = vector.shape_cast %231 : vector<16xf32> to vector<16x1xf32>
    %cst_57 = arith.constant 3.200000e+01 : f32
    %233 = vector.broadcast %cst_57 : f32 to vector<16x1xf32>
    %234 = arith.divf %232, %233 : vector<16x1xf32>
    %235 = vector.broadcast %227 : vector<16x1xf32> to vector<16x32xf32>
    %236 = arith.subf %221, %235 : vector<16x32xf32>
    %cst_58 = arith.constant 9.99999974E-6 : f32
    %237 = vector.broadcast %cst_58 : f32 to vector<16x1xf32>
    %238 = arith.addf %234, %237 : vector<16x1xf32>
    %239 = math.rsqrt %238 : vector<16x1xf32>
    %240 = vector.broadcast %239 : vector<16x1xf32> to vector<16x32xf32>
    %241 = arith.mulf %236, %240 : vector<16x32xf32>
    %242 = vector.broadcast %222 : vector<1x32xf32> to vector<16x32xf32>
    %243 = arith.mulf %241, %242 : vector<16x32xf32>
    %244 = vector.broadcast %223 : vector<1x32xf32> to vector<16x32xf32>
    %245 = arith.addf %243, %244 : vector<16x32xf32>
    %246 = vector.extract_strided_slice %0 {offsets = [4, 0], sizes = [1, 32], strides = [1, 1]} : vector<16x32xf32> to vector<1x32xf32>
    %247 = vector.extract_strided_slice %0 {offsets = [5, 0], sizes = [1, 32], strides = [1, 1]} : vector<16x32xf32> to vector<1x32xf32>
    %cst_59 = arith.constant dense<0.000000e+00> : vector<16xf32>
    %248 = vector.multi_reduction <add>, %221, %cst_59 [1] : vector<16x32xf32> to vector<16xf32>
    %249 = vector.shape_cast %248 : vector<16xf32> to vector<16x1xf32>
    %cst_60 = arith.constant 3.200000e+01 : f32
    %250 = vector.broadcast %cst_60 : f32 to vector<16x1xf32>
    %251 = arith.divf %249, %250 : vector<16x1xf32>
    %252 = vector.broadcast %251 : vector<16x1xf32> to vector<16x32xf32>
    %253 = arith.subf %221, %252 : vector<16x32xf32>
    %254 = arith.mulf %253, %253 : vector<16x32xf32>
    %cst_61 = arith.constant dense<0.000000e+00> : vector<16xf32>
    %255 = vector.multi_reduction <add>, %254, %cst_61 [1] : vector<16x32xf32> to vector<16xf32>
    %256 = vector.shape_cast %255 : vector<16xf32> to vector<16x1xf32>
    %cst_62 = arith.constant 3.200000e+01 : f32
    %257 = vector.broadcast %cst_62 : f32 to vector<16x1xf32>
    %258 = arith.divf %256, %257 : vector<16x1xf32>
    %259 = vector.broadcast %251 : vector<16x1xf32> to vector<16x32xf32>
    %260 = arith.subf %221, %259 : vector<16x32xf32>
    %cst_63 = arith.constant 9.99999974E-6 : f32
    %261 = vector.broadcast %cst_63 : f32 to vector<16x1xf32>
    %262 = arith.addf %258, %261 : vector<16x1xf32>
    %263 = math.rsqrt %262 : vector<16x1xf32>
    %264 = vector.broadcast %263 : vector<16x1xf32> to vector<16x32xf32>
    %265 = arith.mulf %260, %264 : vector<16x32xf32>
    %266 = vector.broadcast %246 : vector<1x32xf32> to vector<16x32xf32>
    %267 = arith.mulf %265, %266 : vector<16x32xf32>
    %268 = vector.broadcast %247 : vector<1x32xf32> to vector<16x32xf32>
    %269 = arith.addf %267, %268 : vector<16x32xf32>
    %cst_64 = arith.constant dense<0.000000e+00> : vector<16x32xf32>
    %270 = tpu.matmul %269, %11, %cst_64 {dimension_numbers = #tpu.dot_dimension_numbers<[1], [0], [0], [1], [0, 0, 1, 1], [], []>} : vector<16x32xf32>, vector<32x32xf32>, vector<16x32xf32> -> vector<16x32xf32>
    %271 = vector.extract_strided_slice %0 {offsets = [9, 0], sizes = [1, 32], strides = [1, 1]} : vector<16x32xf32> to vector<1x32xf32>
    %272 = vector.broadcast %271 : vector<1x32xf32> to vector<16x32xf32>
    %273 = arith.addf %270, %272 : vector<16x32xf32>
    %274 = vector.extract_strided_slice %0 {offsets = [10, 0], sizes = [1, 32], strides = [1, 1]} : vector<16x32xf32> to vector<1x32xf32>
    %275 = vector.extract_strided_slice %0 {offsets = [11, 0], sizes = [1, 32], strides = [1, 1]} : vector<16x32xf32> to vector<1x32xf32>
    %cst_65 = arith.constant dense<0.000000e+00> : vector<16xf32>
    %276 = vector.multi_reduction <add>, %273, %cst_65 [1] : vector<16x32xf32> to vector<16xf32>
    %277 = vector.shape_cast %276 : vector<16xf32> to vector<16x1xf32>
    %cst_66 = arith.constant 3.200000e+01 : f32
    %278 = vector.broadcast %cst_66 : f32 to vector<16x1xf32>
    %279 = arith.divf %277, %278 : vector<16x1xf32>
    %280 = vector.broadcast %279 : vector<16x1xf32> to vector<16x32xf32>
    %281 = arith.subf %273, %280 : vector<16x32xf32>
    %282 = arith.mulf %281, %281 : vector<16x32xf32>
    %cst_67 = arith.constant dense<0.000000e+00> : vector<16xf32>
    %283 = vector.multi_reduction <add>, %282, %cst_67 [1] : vector<16x32xf32> to vector<16xf32>
    %284 = vector.shape_cast %283 : vector<16xf32> to vector<16x1xf32>
    %cst_68 = arith.constant 3.200000e+01 : f32
    %285 = vector.broadcast %cst_68 : f32 to vector<16x1xf32>
    %286 = arith.divf %284, %285 : vector<16x1xf32>
    %287 = vector.broadcast %279 : vector<16x1xf32> to vector<16x32xf32>
    %288 = arith.subf %273, %287 : vector<16x32xf32>
    %cst_69 = arith.constant 9.99999974E-6 : f32
    %289 = vector.broadcast %cst_69 : f32 to vector<16x1xf32>
    %290 = arith.addf %286, %289 : vector<16x1xf32>
    %291 = math.rsqrt %290 : vector<16x1xf32>
    %292 = vector.broadcast %291 : vector<16x1xf32> to vector<16x32xf32>
    %293 = arith.mulf %288, %292 : vector<16x32xf32>
    %294 = vector.broadcast %274 : vector<1x32xf32> to vector<16x32xf32>
    %295 = arith.mulf %293, %294 : vector<16x32xf32>
    %296 = vector.broadcast %275 : vector<1x32xf32> to vector<16x32xf32>
    %297 = arith.addf %295, %296 : vector<16x32xf32>
    %298 = vector.extract_strided_slice %0 {offsets = [6, 0], sizes = [1, 32], strides = [1, 1]} : vector<16x32xf32> to vector<1x32xf32>
    %299 = vector.broadcast %298 : vector<1x32xf32> to vector<16x32xf32>
    %300 = arith.mulf %297, %299 : vector<16x32xf32>
    %301 = vector.extract_strided_slice %0 {offsets = [7, 0], sizes = [1, 32], strides = [1, 1]} : vector<16x32xf32> to vector<1x32xf32>
    %302 = vector.broadcast %301 : vector<1x32xf32> to vector<16x32xf32>
    %303 = arith.mulf %245, %302 : vector<16x32xf32>
    %304 = vector.extract_strided_slice %0 {offsets = [8, 0], sizes = [1, 32], strides = [1, 1]} : vector<16x32xf32> to vector<1x32xf32>
    %305 = vector.broadcast %304 : vector<1x32xf32> to vector<16x32xf32>
    %306 = arith.mulf %245, %305 : vector<16x32xf32>
    %307 = vector.shape_cast %300 : vector<16x32xf32> to vector<2x8x32xf32>
    %308 = vector.shape_cast %303 : vector<16x32xf32> to vector<2x8x32xf32>
    %309 = vector.shape_cast %306 : vector<16x32xf32> to vector<2x8x32xf32>
    "tpu.trace_start"() <{level = 10 : i32, message = "btf,bsf->bts"}> : () -> ()
    %cst_70 = arith.constant dense<0.000000e+00> : vector<2x8x8xf32>
    %310 = tpu.matmul %307, %308, %cst_70 {dimension_numbers = #tpu.dot_dimension_numbers<[2], [2], [1], [1], [0, 0, 0, 1, 1, 1], [0], [0]>} : vector<2x8x32xf32>, vector<2x8x32xf32>, vector<2x8x8xf32> -> vector<2x8x8xf32>
    "tpu.trace_stop"() : () -> ()
    %311 = tpu.iota {dimensions = array<i32: 0>} : vector<8x8xi32>
    %312 = tpu.iota {dimensions = array<i32: 1>} : vector<8x8xi32>
    %313 = arith.cmpi sgt, %312, %311 : vector<8x8xi32>
    %314 = vector.shape_cast %313 : vector<8x8xi1> to vector<1x8x8xi1>
    %cst_71 = arith.constant 0xFF800000 : f32
    %315 = vector.shape_cast %314 : vector<1x8x8xi1> to vector<1x8x8xi1>
    %316 = vector.broadcast %315 : vector<1x8x8xi1> to vector<2x8x8xi1>
    %317 = vector.broadcast %cst_71 : f32 to vector<2x8x8xf32>
    %318 = arith.select %316, %317, %310 : vector<2x8x8xi1>, vector<2x8x8xf32>
    %cst_72 = arith.constant dense<0xFF800000> : vector<2x8xf32>
    %319 = vector.multi_reduction <maximumf>, %318, %cst_72 [2] : vector<2x8x8xf32> to vector<2x8xf32>
    %320 = vector.shape_cast %319 : vector<2x8xf32> to vector<2x8x1xf32>
    %321 = vector.broadcast %320 : vector<2x8x1xf32> to vector<2x8x8xf32>
    %322 = arith.subf %318, %321 : vector<2x8x8xf32>
    %323 = math.exp %322 : vector<2x8x8xf32>
    %cst_73 = arith.constant dense<0.000000e+00> : vector<2x8xf32>
    %324 = vector.multi_reduction <add>, %323, %cst_73 [2] : vector<2x8x8xf32> to vector<2x8xf32>
    %325 = vector.shape_cast %324 : vector<2x8xf32> to vector<2x8x1xf32>
    %326 = tpu.reciprocal %325 {approx = true} : vector<2x8x1xf32> -> vector<2x8x1xf32>
    %327 = vector.broadcast %326 : vector<2x8x1xf32> to vector<2x8x8xf32>
    %328 = arith.mulf %323, %327 : vector<2x8x8xf32>
    "tpu.trace_start"() <{level = 10 : i32, message = "bts,bsf->btf"}> : () -> ()
    %cst_74 = arith.constant dense<0.000000e+00> : vector<2x8x32xf32>
    %329 = tpu.matmul %328, %309, %cst_74 {dimension_numbers = #tpu.dot_dimension_numbers<[2], [1], [1], [2], [0, 0, 0, 1, 1, 2], [0], [0]>} : vector<2x8x8xf32>, vector<2x8x32xf32>, vector<2x8x32xf32> -> vector<2x8x32xf32>
    "tpu.trace_stop"() : () -> ()
    %330 = vector.shape_cast %329 : vector<2x8x32xf32> to vector<16x32xf32>
    %331 = arith.addf %269, %330 : vector<16x32xf32>
    %332 = vector.extract_strided_slice %0 {offsets = [12, 0], sizes = [1, 32], strides = [1, 1]} : vector<16x32xf32> to vector<1x32xf32>
    %333 = vector.extract_strided_slice %0 {offsets = [13, 0], sizes = [1, 32], strides = [1, 1]} : vector<16x32xf32> to vector<1x32xf32>
    %cst_75 = arith.constant dense<0.000000e+00> : vector<16xf32>
    %334 = vector.multi_reduction <add>, %331, %cst_75 [1] : vector<16x32xf32> to vector<16xf32>
    %335 = vector.shape_cast %334 : vector<16xf32> to vector<16x1xf32>
    %cst_76 = arith.constant 3.200000e+01 : f32
    %336 = vector.broadcast %cst_76 : f32 to vector<16x1xf32>
    %337 = arith.divf %335, %336 : vector<16x1xf32>
    %338 = vector.broadcast %337 : vector<16x1xf32> to vector<16x32xf32>
    %339 = arith.subf %331, %338 : vector<16x32xf32>
    %340 = arith.mulf %339, %339 : vector<16x32xf32>
    %cst_77 = arith.constant dense<0.000000e+00> : vector<16xf32>
    %341 = vector.multi_reduction <add>, %340, %cst_77 [1] : vector<16x32xf32> to vector<16xf32>
    %342 = vector.shape_cast %341 : vector<16xf32> to vector<16x1xf32>
    %cst_78 = arith.constant 3.200000e+01 : f32
    %343 = vector.broadcast %cst_78 : f32 to vector<16x1xf32>
    %344 = arith.divf %342, %343 : vector<16x1xf32>
    %345 = vector.broadcast %337 : vector<16x1xf32> to vector<16x32xf32>
    %346 = arith.subf %331, %345 : vector<16x32xf32>
    %cst_79 = arith.constant 9.99999974E-6 : f32
    %347 = vector.broadcast %cst_79 : f32 to vector<16x1xf32>
    %348 = arith.addf %344, %347 : vector<16x1xf32>
    %349 = math.rsqrt %348 : vector<16x1xf32>
    %350 = vector.broadcast %349 : vector<16x1xf32> to vector<16x32xf32>
    %351 = arith.mulf %346, %350 : vector<16x32xf32>
    %352 = vector.broadcast %332 : vector<1x32xf32> to vector<16x32xf32>
    %353 = arith.mulf %351, %352 : vector<16x32xf32>
    %354 = vector.broadcast %333 : vector<1x32xf32> to vector<16x32xf32>
    %355 = arith.addf %353, %354 : vector<16x32xf32>
    %356 = vector.extract_strided_slice %0 {offsets = [14, 0], sizes = [1, 32], strides = [1, 1]} : vector<16x32xf32> to vector<1x32xf32>
    %357 = vector.extract_strided_slice %0 {offsets = [15, 0], sizes = [1, 32], strides = [1, 1]} : vector<16x32xf32> to vector<1x32xf32>
    %cst_80 = arith.constant dense<0.000000e+00> : vector<16xf32>
    %358 = vector.multi_reduction <add>, %331, %cst_80 [1] : vector<16x32xf32> to vector<16xf32>
    %359 = vector.shape_cast %358 : vector<16xf32> to vector<16x1xf32>
    %cst_81 = arith.constant 3.200000e+01 : f32
    %360 = vector.broadcast %cst_81 : f32 to vector<16x1xf32>
    %361 = arith.divf %359, %360 : vector<16x1xf32>
    %362 = vector.broadcast %361 : vector<16x1xf32> to vector<16x32xf32>
    %363 = arith.subf %331, %362 : vector<16x32xf32>
    %364 = arith.mulf %363, %363 : vector<16x32xf32>
    %cst_82 = arith.constant dense<0.000000e+00> : vector<16xf32>
    %365 = vector.multi_reduction <add>, %364, %cst_82 [1] : vector<16x32xf32> to vector<16xf32>
    %366 = vector.shape_cast %365 : vector<16xf32> to vector<16x1xf32>
    %cst_83 = arith.constant 3.200000e+01 : f32
    %367 = vector.broadcast %cst_83 : f32 to vector<16x1xf32>
    %368 = arith.divf %366, %367 : vector<16x1xf32>
    %369 = vector.broadcast %361 : vector<16x1xf32> to vector<16x32xf32>
    %370 = arith.subf %331, %369 : vector<16x32xf32>
    %cst_84 = arith.constant 9.99999974E-6 : f32
    %371 = vector.broadcast %cst_84 : f32 to vector<16x1xf32>
    %372 = arith.addf %368, %371 : vector<16x1xf32>
    %373 = math.rsqrt %372 : vector<16x1xf32>
    %374 = vector.broadcast %373 : vector<16x1xf32> to vector<16x32xf32>
    %375 = arith.mulf %370, %374 : vector<16x32xf32>
    %376 = vector.broadcast %356 : vector<1x32xf32> to vector<16x32xf32>
    %377 = arith.mulf %375, %376 : vector<16x32xf32>
    %378 = vector.broadcast %357 : vector<1x32xf32> to vector<16x32xf32>
    %379 = arith.addf %377, %378 : vector<16x32xf32>
    %cst_85 = arith.constant 0.000000e+00 : f32
    %380 = vector.broadcast %cst_85 : f32 to vector<8x32xf32>
    %c0_86 = arith.constant 0 : index
    %381 = memref.load %arg6[%c0_86] : memref<1xf32, #tpu.memory_space<smem>>
    %382 = vector.broadcast %381 : f32 to vector<8x32xf32>
    %383 = arith.addf %380, %382 : vector<8x32xf32>
    %c0_87 = arith.constant 0 : index
    %c0_88 = arith.constant 0 : index
    %384 = memref.load %arg5[%c0_87, %c0_88] : memref<1x2xf32, #tpu.memory_space<smem>>
    %385 = vector.extract_strided_slice %355 {offsets = [0, 0], sizes = [8, 32], strides = [1, 1]} : vector<16x32xf32> to vector<8x32xf32>
    %386 = vector.broadcast %384 : f32 to vector<8x32xf32>
    %387 = arith.mulf %386, %385 : vector<8x32xf32>
    %388 = arith.addf %383, %387 : vector<8x32xf32>
    %c0_89 = arith.constant 0 : index
    %c1_90 = arith.constant 1 : index
    %389 = memref.load %arg5[%c0_89, %c1_90] : memref<1x2xf32, #tpu.memory_space<smem>>
    %390 = vector.extract_strided_slice %355 {offsets = [8, 0], sizes = [8, 32], strides = [1, 1]} : vector<16x32xf32> to vector<8x32xf32>
    %391 = vector.broadcast %389 : f32 to vector<8x32xf32>
    %392 = arith.mulf %391, %390 : vector<8x32xf32>
    %393 = arith.addf %388, %392 : vector<8x32xf32>
    %cst_91 = arith.constant dense<0.000000e+00> : vector<8x128xf32>
    %394 = tpu.matmul %393, %10, %cst_91 {dimension_numbers = #tpu.dot_dimension_numbers<[1], [0], [0], [1], [0, 0, 1, 1], [], []>} : vector<8x32xf32>, vector<32x128xf32>, vector<8x128xf32> -> vector<8x128xf32>
    %395 = vector.broadcast %3 : vector<1x128xf32> to vector<8x128xf32>
    %396 = arith.addf %394, %395 : vector<8x128xf32>
    %cst_92 = arith.constant 5.000000e-01 : f32
    %397 = vector.broadcast %cst_92 : f32 to vector<8x128xf32>
    %398 = arith.mulf %397, %396 : vector<8x128xf32>
    %cst_93 = arith.constant 0.707106769 : f32
    %399 = vector.broadcast %cst_93 : f32 to vector<8x128xf32>
    %400 = arith.mulf %396, %399 : vector<8x128xf32>
    %cst_94 = arith.constant -3.8325069 : f32
    %cst_95 = arith.constant 3.8325069 : f32
    %401 = vector.broadcast %cst_94 : f32 to vector<8x128xf32>
    %402 = arith.maximumf %401, %400 : vector<8x128xf32>
    %403 = vector.broadcast %cst_95 : f32 to vector<8x128xf32>
    %404 = arith.minimumf %403, %402 : vector<8x128xf32>
    %405 = arith.mulf %404, %404 : vector<8x128xf32>
    %cst_96 = arith.constant 2.29050653E-4 : f32
    %406 = vector.broadcast %cst_96 : f32 to vector<8x128xf32>
    %407 = arith.mulf %406, %405 : vector<8x128xf32>
    %cst_97 = arith.constant 0.00340829091 : f32
    %408 = vector.broadcast %cst_97 : f32 to vector<8x128xf32>
    %409 = arith.addf %407, %408 : vector<8x128xf32>
    %410 = arith.mulf %409, %405 : vector<8x128xf32>
    %cst_98 = arith.constant 0.0509556942 : f32
    %411 = vector.broadcast %cst_98 : f32 to vector<8x128xf32>
    %412 = arith.addf %410, %411 : vector<8x128xf32>
    %413 = arith.mulf %412, %405 : vector<8x128xf32>
    %cst_99 = arith.constant 0.185208321 : f32
    %414 = vector.broadcast %cst_99 : f32 to vector<8x128xf32>
    %415 = arith.addf %413, %414 : vector<8x128xf32>
    %416 = arith.mulf %415, %405 : vector<8x128xf32>
    %cst_100 = arith.constant 1.12837911 : f32
    %417 = vector.broadcast %cst_100 : f32 to vector<8x128xf32>
    %418 = arith.addf %416, %417 : vector<8x128xf32>
    %419 = arith.mulf %404, %418 : vector<8x128xf32>
    %cst_101 = arith.constant -1.17916031E-7 : f32
    %420 = vector.broadcast %cst_101 : f32 to vector<8x128xf32>
    %421 = arith.mulf %420, %405 : vector<8x128xf32>
    %cst_102 = arith.constant 2.35479656E-5 : f32
    %422 = vector.broadcast %cst_102 : f32 to vector<8x128xf32>
    %423 = arith.addf %421, %422 : vector<8x128xf32>
    %424 = arith.mulf %423, %405 : vector<8x128xf32>
    %cst_103 = arith.constant 0.00101796258 : f32
    %425 = vector.broadcast %cst_103 : f32 to vector<8x128xf32>
    %426 = arith.addf %424, %425 : vector<8x128xf32>
    %427 = arith.mulf %426, %405 : vector<8x128xf32>
    %cst_104 = arith.constant 0.0140704699 : f32
    %428 = vector.broadcast %cst_104 : f32 to vector<8x128xf32>
    %429 = arith.addf %427, %428 : vector<8x128xf32>
    %430 = arith.mulf %429, %405 : vector<8x128xf32>
    %cst_105 = arith.constant 0.110985048 : f32
    %431 = vector.broadcast %cst_105 : f32 to vector<8x128xf32>
    %432 = arith.addf %430, %431 : vector<8x128xf32>
    %433 = arith.mulf %432, %405 : vector<8x128xf32>
    %cst_106 = arith.constant 0.497469246 : f32
    %434 = vector.broadcast %cst_106 : f32 to vector<8x128xf32>
    %435 = arith.addf %433, %434 : vector<8x128xf32>
    %436 = arith.mulf %435, %405 : vector<8x128xf32>
    %cst_107 = arith.constant 1.000000e+00 : f32
    %437 = vector.broadcast %cst_107 : f32 to vector<8x128xf32>
    %438 = arith.addf %436, %437 : vector<8x128xf32>
    %439 = arith.divf %419, %438 : vector<8x128xf32>
    %cst_108 = arith.constant 1.000000e+00 : f32
    %440 = vector.broadcast %cst_108 : f32 to vector<8x128xf32>
    %441 = arith.addf %440, %439 : vector<8x128xf32>
    %442 = arith.mulf %398, %441 : vector<8x128xf32>
    %443 = vector.extract_strided_slice %442 {offsets = [0, 0], sizes = [8, 32], strides = [1, 1]} : vector<8x128xf32> to vector<8x32xf32>
    %444 = vector.extract_strided_slice %442 {offsets = [0, 32], sizes = [8, 32], strides = [1, 1]} : vector<8x128xf32> to vector<8x32xf32>
    %445 = arith.addf %443, %444 : vector<8x32xf32>
    %446 = vector.extract_strided_slice %442 {offsets = [0, 64], sizes = [8, 32], strides = [1, 1]} : vector<8x128xf32> to vector<8x32xf32>
    %447 = arith.addf %445, %446 : vector<8x32xf32>
    %448 = vector.extract_strided_slice %442 {offsets = [0, 96], sizes = [8, 32], strides = [1, 1]} : vector<8x128xf32> to vector<8x32xf32>
    %449 = arith.addf %447, %448 : vector<8x32xf32>
    %450 = arith.addf %449, %393 : vector<8x32xf32>
    %451 = vector.shape_cast %379 : vector<16x32xf32> to vector<2x8x32xf32>
    %452 = vector.shape_cast %450 : vector<8x32xf32> to vector<1x8x32xf32>
    %453 = vector.broadcast %452 : vector<1x8x32xf32> to vector<2x8x32xf32>
    %454 = arith.addf %451, %453 : vector<2x8x32xf32>
    %c0_109 = arith.constant 0 : index
    %c0_110 = arith.constant 0 : index
    %c0_111 = arith.constant 0 : index
    %455 = vector.load %arg7[%c0_109, %c0_110, %c0_111] : memref<2x8x32xf32, #tpu.memory_space<vmem>>, vector<2x8x32xf32>
    tpu.vector_store %arg7[%c0_109, %c0_110, %c0_111], %454 {strides = array<i32>} : memref<2x8x32xf32, #tpu.memory_space<vmem>>, vector<2x8x32xf32>,
    return
  }
}

</mosaic_0001>

<bundles_post_ra>
// kernel: tpu_custom_call.1
= control target key start
LH: loop header
LB: loop body
LE: loop exit
PB: predicated region body
PF: predicated region fallthrough
CT: control target
= control target key end

     0   :  { %13 = vsyncpa [#allocation5], 0  ;;  %s3269_s0 = inlined_call_operand.hbm [shape: f32[2,8,32], index: 0, kind: input, shape index: {}]   ;;  %s3270_s1 = inlined_call_operand.hbm [shape: f32[16,32], index: 1, kind: input, shape index: {}]   ;;  %s3271_s2 = inlined_call_operand.vmem [shape: f32[2,128], index: 2, kind: input, shape index: {}]   ;;  %s3272_s3 = inlined_call_operand.hbm [shape: f32[3,32,128], index: 3, kind: input, shape index: {}]   ;;  %s3273_s4 = inlined_call_operand.hbm [shape: f32[32,32], index: 4, kind: input, shape index: {}]   ;;  %s3274_s5 = inlined_call_operand.vmem [shape: f32[1,2], index: 5, kind: input, shape index: {}]   ;;  %s3275_s6 = inlined_call_operand.<no memory space> [shape: f32[1], index: 6, kind: input, shape index: {}]   ;;  %s3276_s7 = inlined_call_operand.hbm [shape: f32[2,8,32], index: 7, kind: output, shape index: {}]  }
   0x1   :  { %14 = vsyncpa [#allocation9], 0 }
   0x2   :  { %15 = vsyncpa [#allocation12], 0 }
   0x3   :  { %16 = vsyncpa [#allocation7], 0 }
   0x4   :  { %17 = vsyncpa [#allocation6], 0  ;;  %s2766_s24 = smov [#allocation8]   ;;  %s2767_s26 = smov [#allocation4]  }
   0x5   :  { %s35_s25 = sshll.u32 %s2766_s24, 4  ;;  %s23_s27 = sshll.u32 %s2767_s26, 4  ;;  %s36_s25 = int_to_ptr.vmem [resolvable:$true] %s35_s25  ;;  %s2820_s27 = int_to_ptr.vmem [resolvable:$true] %s23_s27 }
   0x6   :  { %s2634_s30 = scalar_lea.hbm %s3270_s1, 256 }
   0x7   :  { %p2635_p0 = scmp.ne.s32.totalorder %s3270_s1, %s2634_s30  ;;  %p2638_p1 = scmp.lt.u32.totalorder %s2634_s30, %s3270_s1 }
   0x9   :  { %p2640_p2 = pnand %p2638_p1, %p2635_p0 }
   0xb   :  { %2643 = shalt.err (!%p2640_p2)
}
   0xc   :  { %s2644_s12 = scalar_lea.vmem %s36_s25, 256  ;;  %p2649_p4 = scmp.lt.s32.totalorder %s36_s25, %s36_s25 }
   0xd   :  { %p2645_p3 = scmp.ne.s32.totalorder %s36_s25, %s2644_s12  ;;  %p2650_p5 = scmp.lt.s32.totalorder %s2644_s12, %s2644_s12 }
   0xf   :  { %p2651_p6 = por %p2650_p5, %p2649_p4 }
  0x11   :  { %p2652_p7 = pnand %p2651_p6, %p2645_p3 }
  0x13   :  { %2655 = shalt.err (!%p2652_p7)
}
  0x14   :  { %s2768_s13 = smov 128   ;;  %s2769_s14 = smov 8  }
  0x15   :  { %41 = dma.hbm_to_vmem [thread:$0]  %s3270_s1, 256, %s36_s25, [#allocation9], %s2768_s13, %s2768_s13, %s2769_s14  }
  0x16   :  { %s2656_s19 = scalar_lea.hbm %s3269_s0, 256 }
  0x17   :  { %p2657_p8 = scmp.ne.s32.totalorder %s3269_s0, %s2656_s19  ;;  %p2660_p9 = scmp.lt.u32.totalorder %s2656_s19, %s3269_s0 }
  0x19   :  { %p2662_p10 = pnand %p2660_p9, %p2657_p8 }
  0x1b   :  { %2665 = shalt.err (!%p2662_p10)
}
  0x1c   :  { %s2666_s24 = scalar_lea.vmem %s2820_s27, 256  ;;  %p2671_p12 = scmp.lt.s32.totalorder %s2820_s27, %s2820_s27 }
  0x1d   :  { %p2667_p11 = scmp.ne.s32.totalorder %s2820_s27, %s2666_s24  ;;  %p2672_p13 = scmp.lt.s32.totalorder %s2666_s24, %s2666_s24 }
  0x1f   :  { %p2673_p0 = por %p2672_p13, %p2671_p12 }
  0x21   :  { %p2674_p1 = pnand %p2673_p0, %p2667_p11 }
  0x23   :  { %2677 = shalt.err (!%p2674_p1)
}
  0x24   :  { %29 = dma.hbm_to_vmem [thread:$0]  %s3269_s0, 256, %s2820_s27, [#allocation5], %s2768_s13, %s2768_s13, %s2769_s14  }
  0x25   :  { %s2770_s26 = smov [#allocation10]   ;;  %s2771_s29 = smov [#allocation11]  }
  0x26   :  { %s49_s28 = sshll.u32 %s2770_s26, 4  ;;  %s61_s30 = sshll.u32 %s2771_s29, 4  ;;  %s50_s28 = int_to_ptr.vmem [resolvable:$true] %s49_s28  ;;  %s2857_s30 = int_to_ptr.vmem [resolvable:$true] %s61_s30 }
  0x27   :  { %s2678_s10 = scalar_lea.hbm %s3272_s3, 1536 }
  0x28   :  { %p2679_p2 = scmp.ne.s32.totalorder %s3272_s3, %s2678_s10  ;;  %p2682_p3 = scmp.lt.u32.totalorder %s2678_s10, %s3272_s3 }
  0x2a   :  { %p2684_p4 = pnand %p2682_p3, %p2679_p2 }
  0x2c   :  { %2687 = shalt.err (!%p2684_p4)
}
  0x2d   :  { %s2688_s0 = scalar_lea.vmem %s50_s28, 1536  ;;  %p2693_p6 = scmp.lt.s32.totalorder %s50_s28, %s50_s28 }
  0x2e   :  { %p2689_p5 = scmp.ne.s32.totalorder %s50_s28, %s2688_s0  ;;  %p2694_p7 = scmp.lt.s32.totalorder %s2688_s0, %s2688_s0 }
  0x30   :  { %p2695_p8 = por %p2694_p7, %p2693_p6 }
  0x32   :  { %p2696_p9 = pnand %p2695_p8, %p2689_p5 }
  0x34   :  { %2699 = shalt.err (!%p2696_p9)
}
  0x35   :  { %55 = dma.hbm_to_vmem [thread:$0]  %s3272_s3, 1536, %s50_s28, [#allocation9], %s2768_s13, %s2768_s13, %s2769_s14  }
  0x36   :  { %s2700_s20 = scalar_lea.hbm %s3273_s4, 512 }
  0x37   :  { %p2701_p10 = scmp.ne.s32.totalorder %s3273_s4, %s2700_s20  ;;  %p2704_p11 = scmp.lt.u32.totalorder %s2700_s20, %s3273_s4 }
  0x39   :  { %p2706_p12 = pnand %p2704_p11, %p2701_p10 }
  0x3b   :  { %2709 = shalt.err (!%p2706_p12)
}
  0x3c   :  { %s2710_s1 = scalar_lea.vmem %s2857_s30, 512  ;;  %p2715_p0 = scmp.lt.s32.totalorder %s2857_s30, %s2857_s30 }
  0x3d   :  { %p2711_p13 = scmp.ne.s32.totalorder %s2857_s30, %s2710_s1  ;;  %p2716_p1 = scmp.lt.s32.totalorder %s2710_s1, %s2710_s1 }
  0x3f   :  { %p2717_p2 = por %p2716_p1, %p2715_p0 }
  0x41   :  { %p2718_p3 = pnand %p2717_p2, %p2711_p13 }
  0x43   :  { %2721 = shalt.err (!%p2718_p3)
}
  0x44   :  { %67 = dma.hbm_to_vmem [thread:$0]  %s3273_s4, 512, %s2857_s30, [#allocation12], %s2768_s13, %s2768_s13, %s2769_s14  }
  0x45   :  { %s74_s29 = sshll.u32 %s3274_s5, 4  ;;  %s75_s29 = int_to_ptr.vmem [resolvable:$true] %s74_s29 }
  0x46   :  { %s2722_s8 = scalar_lea.vmem %s75_s29, 16  ;;  %p2727_p5 = scmp.lt.s32.totalorder %s75_s29, %s75_s29 }
  0x47   :  { %p2723_p4 = scmp.ne.s32.totalorder %s75_s29, %s2722_s8  ;;  %p2728_p6 = scmp.lt.s32.totalorder %s2722_s8, %s2722_s8 }
  0x49   :  { %p2729_p7 = por %p2728_p6, %p2727_p5 }
  0x4b   :  { %p2730_p8 = pnand %p2729_p7, %p2723_p4 }
  0x4d   :  { %2733 = shalt.err (!%p2730_p8)
}
  0x4e   :  { %s2772_s9 = smov [#allocation13]  }
  0x4f   :  { %77 = dma.vmem_to_smem %s75_s29, 16, %s2772_s9, [#allocation7]  }
  0x50   :  { %2756 = dma.done.wait [#allocation5], 256  }
  0x51   :  { %2757 = vsyncadd [#allocation5], 4294967040 }
  0x52   :  { %2758 = dma.done.wait [#allocation9], 1792  }
  0x53   :  { %2759 = vsyncadd [#allocation9], 4294965504 }
  0x54   :  { %2760 = dma.done.wait [#allocation12], 512  }
  0x55   :  { %2761 = vsyncadd [#allocation12], 4294966784 }
  0x56   :  { %2762 = dma.done.wait [#allocation7], 16  }
  0x57   :  { %2763 = vsyncadd [#allocation7], 4294967280 }
  0x58   :  { %95 = sfence }
  0x59   :  { %v115_v0 = vld [vmem:[#allocation4] sm:$0xff]  ;;  %vm117_vm0 = vcmask 261120   ;;  %v116_v1 = vld [vmem:[#allocation4 + $0x8] sm:$0xff]  ;;  %v2773_v17 = vmov 0.0|0.0   ;;  %v101_v20 = vld [vmem:[#allocation10 + $0x10] sm:$0xff]  ;;  %vm2774_vm1 = vmmov 0   ;;  %v145_v30 = vlaneseq }
  0x5a   :  { %v118_v2 = vsel %vm117_vm0, %v115_v0, 0.0  ;;  %v121_v3 = vsel %vm117_vm0, %v116_v1, 0.0  ;;  %v99_v14 = vld [vmem:[#allocation10] sm:$0xff]  ;;  %v100_v15 = vld [vmem:[#allocation10 + $0x8] sm:$0xff]  ;;  %2402 = vmatprep.subr.bf16.mxu1 %v2773_v17  ;;  %v102_v21 = vld [vmem:[#allocation10 + $0x18] sm:$0xff]  ;;  %v2775_v27 = vmov 0.0  }
  0x5b   :  { %119 = vadd.xlane.f32.xlu0 %v118_v2  ;;  %v103_v16 = vld [vmem:[#allocation10 + $0x20] sm:$0xff]  ;;  %v2394_v18 = vpack.c.bf16 %v100_v15, %v99_v14  ;;  %v104_v19 = vld [vmem:[#allocation10 + $0x28] sm:$0xff]  ;;  %v2398_v23 = vpack.c.bf16 %v102_v21, %v101_v20  ;;  %v105_v24 = vld [vmem:[#allocation10 + $0x30] sm:$0xff]  ;;  %2272 = vmatprep.mubr.msk.f32.mxu1 %vm2774_vm1, %v2775_v27  ;;  %v2921_v34 = vshrl.u32 %v145_v30, 7  ;;  %s2776_s30 = smov 64   ;;  %s2777_s10 = smov 32  }
  0x5c   :  { %v2902_v22 = vpack.c.bf16 %v104_v19, %v103_v16  ;;  %v106_v25 = vld [vmem:[#allocation10 + $0x38] sm:$0xff]  ;;  %v96_v37 = vld [vmem:[#allocation8] sm:$0xff]  ;;  %vm381_vm2 = vcmask 1041409   ;;  %vm377_vm3 = vcmask 253952   ;;  %vm525_vm4 = vcmask 254977   ;;  %s1999_s11 = sld [smem:[#allocation13]] }
  0x5d   :  { %2395 = vmatprep.subr.bf16.mxu0 %v2394_v18  ;;  %v2907_v26 = vpack.c.bf16 %v106_v25, %v105_v24  ;;  %v2924_v36 = vsub.s32 0, %v2921_v34  ;;  %v2927_v38 = vsub.s32 1, %v2921_v34  ;;  %v98_v51 = vld [vmem:[%s3271_s2] sm:$0x3]  ;;  %vm673_vm5 = vcmask 256002   ;;  %s2185_s12 = sld [smem:[#allocation13 + $0x1]] }
  0x5e   :  { %2404 = vmatpush3.bf16.msra.mxu1 %v2902_v22  ;;  %2397 = vmatpush3.bf16.msra.mxu0 %v2394_v18  ;;  %vm822_vm6 = vcmask 257027   ;;  %vm971_vm7 = vcmask 258052   ;;  %vm1120_vm8 = vcmask 259077   ;;  %vm1269_vm9 = vcmask 260102  }
  0x5f   :  { %122 = vadd.xlane.f32.xlu0 %v121_v3  ;;  %2405 = vmatprep.subr.bf16.mxu1 %v2773_v17  ;;  %v148_v39 = vrot.slane %v96_v37, %v2924_v36  ;;  %v154_v42 = vrot.slane %v96_v37, %v2927_v38  ;;  %v160_v52 = vrot.slane %v98_v51, %v2924_v36  ;;  %vm1418_vm10 = vcmask 261127  }
  0x60   :  { %2399 = vmatprep.subr.bf16.mxu0 %v2398_v23  ;;  %vm1775_vm12 = vcmask 64512  }
  0x62   :  { %2401 = vmatpush3.bf16.msra.mxu0 %v2398_v23  ;;  %2407 = vmatpush3.bf16.msra.mxu1 %v2907_v26 }
  0x63   :  { %2408 = vmatprep.subr.bf16.mxu0 %v2773_v17  ;;  %2414 = vmatprep.subr.bf16.mxu1 %v2773_v17 }
  0x65   :  { %2273 = vmatmul.mubr.f32.vlgmr.msra.gmra.mrb[0].mxu1 %v2775_v27 }
  0x66   :  { %2416 = vmatpush3.bf16.msra.mxu1 %v2902_v22  ;;  %2294 = vmatprep.mubr.msk.f32.mxu1 %vm2774_vm1, %v2775_v27 }
  0x67   :  { %2417 = vmatprep.subr.bf16.mxu1 %v2773_v17 }
  0x6a   :  { %2419 = vmatpush3.bf16.msra.mxu1 %v2907_v26 }
  0x6b   :  { %2426 = vmatprep.subr.bf16.mxu1 %v2773_v17 }
  0xe8   :  { %v120_v4 = vpop.xlane.xlu0 %119 }
  0xe9   :  { %v125_v5 = vmul.f32 0.03125, %v120_v4 }
  0xeb   :  { %v127_v6 = vsub.f32 %v115_v0, %v125_v5 }
  0xec   :  { %v123_v7 = vpop.xlane.xlu0 %122 }
  0xed   :  { %v126_v8 = vmul.f32 0.03125, %v123_v7  ;;  %v129_v9 = vmul.f32 %v127_v6, %v127_v6 }
  0xef   :  { %v128_v10 = vsub.f32 %v116_v1, %v126_v8  ;;  %v131_v11 = vsel %vm117_vm0, %v129_v9, 0.0 }
  0xf0   :  { %132 = vadd.xlane.f32.xlu1 %v131_v11 }
  0xf1   :  { %v130_v12 = vmul.f32 %v128_v10, %v128_v10 }
  0xf3   :  { %v134_v13 = vsel %vm117_vm0, %v130_v12, 0.0 }
  0xf4   :  { %135 = vadd.xlane.f32.xlu1 %v134_v13 }
 0x138   :  { %v311_v49 = vpop.f32.mrb[0].mxu1 }
 0x139   :  { %v2274_v50 = vpop.f32.mrb[1].mxu1  ;;  %v316_v53 = vrot.slane %v311_v49, 1 }
 0x17d   :  { %v133_v28 = vpop.xlane.xlu1 %132 }
 0x17e   :  { %v137_v29 = vmul.f32 0.03125, %v133_v28 }
 0x180   :  { %v139_v31 = vadd.f32 1e-05, %v137_v29 }
 0x181   :  { %v136_v32 = vpop.xlane.xlu1 %135 }
 0x182   :  { %2478 = vrsqrt.f32 %v139_v31  ;;  %v138_v33 = vmul.f32 0.03125, %v136_v32 }
 0x184   :  { %v140_v35 = vadd.f32 1e-05, %v138_v33 }
 0x186   :  { %2480 = vrsqrt.f32 %v140_v35 }
 0x18c   :  { %v2479_v40 = vpop.eup %2478 }
 0x18d   :  { %v143_v41 = vmul.f32 %v2479_v40, %v127_v6 }
 0x18f   :  { %v149_v43 = vmul.f32 %v148_v39, %v143_v41 }
 0x190   :  { %v2481_v44 = vpop.eup %2480 }
 0x191   :  { %v144_v45 = vmul.f32 %v2481_v44, %v128_v10  ;;  %v155_v46 = vadd.f32 %v154_v42, %v149_v43 }
 0x193   :  { %v150_v47 = vmul.f32 %v148_v39, %v144_v45  ;;  %2261 = vmatprep.mubr.msk.f32.mxu0 %vm117_vm0, %v155_v46 }
 0x195   :  { %v156_v48 = vadd.f32 %v154_v42, %v150_v47 }
 0x197   :  { %2262 = vmatmul.mubr.msk.f32.vlgmr.msra.gmra.mrb[0].mxu0 %vm117_vm0, %v156_v48 }
 0x198   :  { %2410 = vmatpush3.bf16.msra.mxu0 %v2902_v22  ;;  %2283 = vmatprep.mubr.msk.f32.mxu0 %vm2774_vm1, %v2775_v27 }
 0x199   :  { %2411 = vmatprep.subr.bf16.mxu0 %v2773_v17 }
 0x19c   :  { %2413 = vmatpush3.bf16.msra.mxu0 %v2907_v26 }
 0x19d   :  { %2420 = vmatprep.subr.bf16.mxu0 %v2773_v17 }
 0x26a   :  { %v2263_v54 = vpop.f32.mrb[0].mxu0 }
 0x26b   :  { %v2943_v55 = vadd.f32 %v2263_v54, %v160_v52  ;;  %v233_v56 = vpop.f32.mrb[1].mxu0 }
 0x26c   :  { %v2945_v57 = vadd.f32 %v233_v56, %v160_v52 }
 0x26d   :  { %v320_v58 = vadd.f32 %v316_v53, %v2943_v55 }
 0x26e   :  { %v319_v59 = vadd.f32 %v311_v49, %v2945_v57 }
 0x26f   :  { %2482 = vtanh.f32 %v320_v58  ;;  %v2155_v62 = vmul.f32 -1.442695, %v320_v58 }
 0x270   :  { %2484 = vtanh.f32 %v319_v59  ;;  %v2154_v63 = vmul.f32 -1.442695, %v319_v59 }
 0x271   :  { %2486 = vpow2.f32 %v2155_v62 }
 0x272   :  { %2488 = vpow2.f32 %v2154_v63 }
 0x279   :  { %v2483_v60 = vpop.eup %2482 }
 0x27a   :  { %v2485_v61 = vpop.eup %2484  ;;  %341 = vrot.lane.b32.xlu0 %v2483_v60, %s2776_s30 }
 0x27b   :  { %339 = vrot.lane.b32.xlu1 %v2485_v61, %s2776_s30  ;;  %v2487_v0 = vpop.eup %2486 }
 0x27c   :  { %v328_v1 = vadd.f32 1.0, %v2487_v0  ;;  %v2489_v2 = vpop.eup %2488 }
 0x27d   :  { %v327_v3 = vadd.f32 1.0, %v2489_v2 }
 0x27e   :  { %2490 = vrcp.f32 %v328_v1 }
 0x27f   :  { %2492 = vrcp.f32 %v327_v3 }
 0x288   :  { %v2491_v4 = vpop.eup %2490 }
 0x289   :  { %v2493_v8 = vpop.eup %2492  ;;  %v336_v10 = vmul.f32 0.0, %v2491_v4 }
 0x28a   :  { %v335_v13 = vmul.f32 0.0, %v2493_v8 }
 0x2ec   :  { %v342_v5 = vpop.permute.xlu0 %341 }
 0x2ed   :  { %v346_v6 = vmul.f32 %v2491_v4, %v342_v5  ;;  %v340_v7 = vpop.permute.xlu1 %339 }
 0x2ee   :  { %v345_v9 = vmul.f32 %v2493_v8, %v340_v7 }
 0x2ef   :  { %351 = vrot.lane.b32.xlu1 %v346_v6, %s2777_s10 }
 0x2f3   :  { %349 = vrot.lane.b32.xlu1 %v345_v9, %s2777_s10 }
 0x361   :  { %v352_v11 = vpop.permute.xlu1 %351 }
 0x362   :  { %v356_v12 = vadd.f32 %v352_v11, %v336_v10 }
 0x364   :  { %2494 = vtanh.f32 %v356_v12  ;;  %v480_v52 = vrot.slane %v356_v12, 7 }
 0x365   :  { %v350_v14 = vpop.permute.xlu1 %349 }
 0x366   :  { %v355_v15 = vadd.f32 %v350_v14, %v335_v13 }
 0x368   :  { %2496 = vtanh.f32 %v355_v15  ;;  %v479_v54 = vrot.slane %v355_v15, 7 }
 0x36e   :  { %v2495_v16 = vpop.eup %2494 }
 0x36f   :  { %363 = vrot.lane.b32.xlu0 %v2495_v16, %s2776_s30 }
 0x372   :  { %v2497_v18 = vpop.eup %2496 }
 0x373   :  { %361 = vrot.lane.b32.xlu1 %v2497_v18, %s2776_s30 }
 0x3e1   :  { %v364_v19 = vpop.permute.xlu0 %363 }
 0x3e2   :  { %v2955_v20 = vmul.f32 %v2491_v4, %v364_v19 }
 0x3e4   :  { %v380_v23 = vrot.slane %v2955_v20, 7 }
 0x3e5   :  { %v362_v21 = vpop.permute.xlu1 %361 }
 0x3e6   :  { %v2958_v24 = vmul.f32 %v2493_v8, %v362_v21 }
 0x3e8   :  { %v382_v25 = vsel %vm381_vm2, %v380_v23, %v2958_v24 }
 0x3e9   :  { %383 = vrot.lane.b32.xlu0 %v382_v25, %s2777_s10 }
 0x45b   :  { %v384_v28 = vpop.permute.xlu0 %383 }
 0x45c   :  { %2284 = vmatmul.mubr.msk.f32.vlgmr.msra.gmra.mrb[2].mxu0 %vm117_vm0, %v384_v28 }
 0x45d   :  { %2422 = vmatpush3.bf16.msra.mxu0 %v2902_v22  ;;  %2305 = vmatprep.mubr.msk.f32.mxu0 %vm2774_vm1, %v2775_v27 }
 0x45e   :  { %2423 = vmatprep.subr.bf16.mxu0 %v2773_v17 }
 0x461   :  { %2425 = vmatpush3.bf16.msra.mxu0 %v2907_v26 }
 0x462   :  { %2432 = vmatprep.subr.bf16.mxu0 %v2773_v17 }
 0x52f   :  { %v453_v29 = vpop.f32.mrb[2].mxu0 }
 0x530   :  { %v458_v31 = vrot.slane %v453_v29, 7  ;;  %v462_v32 = vadd.f32 %v453_v29, %v2943_v55  ;;  %v2285_v33 = vpop.f32.mrb[3].mxu0 }
 0x532   :  { %v461_v35 = vadd.f32 %v458_v31, %v2945_v57  ;;  %2498 = vtanh.f32 %v462_v32  ;;  %v2158_v40 = vmul.f32 -1.442695, %v462_v32 }
 0x534   :  { %2500 = vtanh.f32 %v461_v35  ;;  %v2157_v41 = vmul.f32 -1.442695, %v461_v35 }
 0x535   :  { %2502 = vpow2.f32 %v2158_v40 }
 0x536   :  { %2504 = vpow2.f32 %v2157_v41 }
 0x53c   :  { %v2499_v37 = vpop.eup %2498 }
 0x53d   :  { %489 = vrot.lane.b32.xlu0 %v2499_v37, %s2776_s30 }
 0x53e   :  { %v2501_v39 = vpop.eup %2500 }
 0x53f   :  { %487 = vrot.lane.b32.xlu1 %v2501_v39, %s2776_s30  ;;  %v2503_v42 = vpop.eup %2502 }
 0x540   :  { %v2505_v43 = vpop.eup %2504  ;;  %v470_v44 = vadd.f32 1.0, %v2503_v42 }
 0x541   :  { %v469_v45 = vadd.f32 1.0, %v2505_v43 }
 0x542   :  { %2506 = vrcp.f32 %v470_v44 }
 0x543   :  { %2508 = vrcp.f32 %v469_v45 }
 0x54c   :  { %v2507_v46 = vpop.eup %2506 }
 0x54d   :  { %v2509_v49 = vpop.eup %2508  ;;  %v484_v53 = vmul.f32 %v2507_v46, %v480_v52 }
 0x54e   :  { %v483_v59 = vmul.f32 %v2509_v49, %v479_v54 }
 0x5af   :  { %v490_v47 = vpop.permute.xlu0 %489 }
 0x5b0   :  { %v494_v48 = vmul.f32 %v2507_v46, %v490_v47 }
 0x5b1   :  { %v488_v50 = vpop.permute.xlu1 %487 }
 0x5b2   :  { %499 = vrot.lane.b32.xlu0 %v494_v48, %s2777_s10  ;;  %v493_v51 = vmul.f32 %v2509_v49, %v488_v50 }
 0x5b4   :  { %497 = vrot.lane.b32.xlu1 %v493_v51, %s2777_s10 }
 0x624   :  { %v500_v56 = vpop.permute.xlu0 %499 }
 0x625   :  { %v504_v58 = vadd.f32 %v500_v56, %v484_v53 }
 0x626   :  { %v498_v60 = vpop.permute.xlu1 %497 }
 0x627   :  { %2510 = vtanh.f32 %v504_v58  ;;  %v503_v61 = vadd.f32 %v498_v60, %v483_v59  ;;  %v628_v37 = vrot.slane %v504_v58, 7 }
 0x629   :  { %2512 = vtanh.f32 %v503_v61  ;;  %v627_v35 = vrot.slane %v503_v61, 7 }
 0x631   :  { %v2511_v62 = vpop.eup %2510 }
 0x632   :  { %511 = vrot.lane.b32.xlu0 %v2511_v62, %s2776_s30 }
 0x633   :  { %v2513_v63 = vpop.eup %2512 }
 0x634   :  { %509 = vrot.lane.b32.xlu1 %v2513_v63, %s2776_s30 }
 0x6a4   :  { %v512_v0 = vpop.permute.xlu0 %511 }
 0x6a5   :  { %v2980_v3 = vmul.f32 %v2507_v46, %v512_v0 }
 0x6a6   :  { %v510_v1 = vpop.permute.xlu1 %509 }
 0x6a7   :  { %v2978_v2 = vmul.f32 %v2509_v49, %v510_v1 }
 0x6a9   :  { %v528_v4 = vrot.slane %v2978_v2, 1 }
 0x6ab   :  { %v529_v5 = vsel %vm381_vm2, %v2980_v3, %v528_v4 }
 0x6ac   :  { %530 = vrot.lane.b32.xlu1 %v529_v5, %s2777_s10 }
 0x71e   :  { %v531_v6 = vpop.permute.xlu1 %530 }
 0x71f   :  { %2295 = vmatmul.mubr.msk.f32.vlgmr.msra.gmra.mrb[2].mxu1 %vm117_vm0, %v531_v6 }
 0x720   :  { %2428 = vmatpush3.bf16.msra.mxu1 %v2902_v22  ;;  %2316 = vmatprep.mubr.msk.f32.mxu1 %vm2774_vm1, %v2775_v27 }
 0x721   :  { %2429 = vmatprep.subr.bf16.mxu1 %v2773_v17 }
 0x724   :  { %2431 = vmatpush3.bf16.msra.mxu1 %v2907_v26 }
 0x725   :  { %2438 = vmatprep.subr.bf16.mxu1 %v2773_v17 }
 0x7f2   :  { %v600_v7 = vpop.f32.mrb[2].mxu1 }
 0x7f3   :  { %v605_v8 = vrot.slane %v600_v7, 6  ;;  %v606_v9 = vrot.slane %v600_v7, 7  ;;  %v2296_v10 = vpop.f32.mrb[3].mxu1 }
 0x7f5   :  { %v609_v11 = vadd.f32 %v605_v8, %v2945_v57  ;;  %v610_v12 = vadd.f32 %v606_v9, %v2943_v55 }
 0x7f7   :  { %2514 = vtanh.f32 %v609_v11  ;;  %v2160_v15 = vmul.f32 -1.442695, %v609_v11  ;;  %v2161_v16 = vmul.f32 -1.442695, %v610_v12 }
 0x7f8   :  { %2516 = vtanh.f32 %v610_v12 }
 0x7f9   :  { %2518 = vpow2.f32 %v2160_v15 }
 0x7fa   :  { %2520 = vpow2.f32 %v2161_v16 }
 0x801   :  { %v2515_v13 = vpop.eup %2514 }
 0x802   :  { %v2517_v14 = vpop.eup %2516  ;;  %635 = vrot.lane.b32.xlu0 %v2515_v13, %s2776_s30 }
 0x803   :  { %637 = vrot.lane.b32.xlu1 %v2517_v14, %s2776_s30  ;;  %v2519_v18 = vpop.eup %2518 }
 0x804   :  { %v2521_v19 = vpop.eup %2520  ;;  %v617_v21 = vadd.f32 1.0, %v2519_v18 }
 0x805   :  { %v618_v23 = vadd.f32 1.0, %v2521_v19 }
 0x806   :  { %2522 = vrcp.f32 %v617_v21 }
 0x807   :  { %2524 = vrcp.f32 %v618_v23 }
 0x810   :  { %v2523_v25 = vpop.eup %2522 }
 0x811   :  { %v2525_v29 = vpop.eup %2524  ;;  %v631_v39 = vmul.f32 %v2523_v25, %v627_v35 }
 0x812   :  { %v632_v40 = vmul.f32 %v2525_v29, %v628_v37 }
 0x874   :  { %v636_v28 = vpop.permute.xlu0 %635 }
 0x875   :  { %v638_v31 = vpop.permute.xlu1 %637  ;;  %v641_v32 = vmul.f32 %v2523_v25, %v636_v28 }
 0x876   :  { %v642_v33 = vmul.f32 %v2525_v29, %v638_v31 }
 0x877   :  { %645 = vrot.lane.b32.xlu0 %v641_v32, %s2777_s10 }
 0x878   :  { %647 = vrot.lane.b32.xlu1 %v642_v33, %s2777_s10 }
 0x8e9   :  { %v646_v41 = vpop.permute.xlu0 %645 }
 0x8ea   :  { %v648_v42 = vpop.permute.xlu1 %647  ;;  %v651_v43 = vadd.f32 %v646_v41, %v631_v39 }
 0x8eb   :  { %v652_v44 = vadd.f32 %v648_v42, %v632_v40 }
 0x8ec   :  { %2526 = vtanh.f32 %v651_v43  ;;  %v776_v15 = vrot.slane %v651_v43, 7 }
 0x8ed   :  { %2528 = vtanh.f32 %v652_v44  ;;  %v777_v16 = vrot.slane %v652_v44, 7 }
 0x8f6   :  { %v2527_v45 = vpop.eup %2526 }
 0x8f7   :  { %v2529_v46 = vpop.eup %2528  ;;  %657 = vrot.lane.b32.xlu0 %v2527_v45, %s2776_s30 }
 0x8f8   :  { %659 = vrot.lane.b32.xlu1 %v2529_v46, %s2776_s30 }
 0x969   :  { %v658_v47 = vpop.permute.xlu0 %657 }
 0x96a   :  { %v660_v48 = vpop.permute.xlu1 %659  ;;  %v3001_v49 = vmul.f32 %v2523_v25, %v658_v47 }
 0x96b   :  { %v3003_v50 = vmul.f32 %v2525_v29, %v660_v48 }
 0x96c   :  { %v676_v51 = vrot.slane %v3001_v49, 2 }
 0x96d   :  { %v677_v52 = vrot.slane %v3003_v50, 1 }
 0x96f   :  { %v678_v53 = vsel %vm381_vm2, %v677_v52, %v676_v51 }
 0x970   :  { %679 = vrot.lane.b32.xlu0 %v678_v53, %s2777_s10 }
 0x9e2   :  { %v680_v54 = vpop.permute.xlu0 %679 }
 0x9e3   :  { %2306 = vmatmul.mubr.msk.f32.vlgmr.msra.gmra.mrb[4].mxu0 %vm117_vm0, %v680_v54 }
 0x9e4   :  { %2434 = vmatpush3.bf16.msra.mxu0 %v2902_v22  ;;  %2327 = vmatprep.mubr.msk.f32.mxu0 %vm2774_vm1, %v2775_v27 }
 0x9e5   :  { %2435 = vmatprep.subr.bf16.mxu0 %v2773_v17 }
 0x9e8   :  { %2437 = vmatpush3.bf16.msra.mxu0 %v2907_v26 }
 0x9e9   :  { %2444 = vmatprep.subr.bf16.mxu0 %v2773_v17 }
 0xab6   :  { %v749_v56 = vpop.f32.mrb[4].mxu0 }
 0xab7   :  { %v754_v58 = vrot.slane %v749_v56, 5  ;;  %v755_v59 = vrot.slane %v749_v56, 6  ;;  %v2307_v60 = vpop.f32.mrb[5].mxu0 }
 0xab9   :  { %v758_v61 = vadd.f32 %v754_v58, %v2945_v57  ;;  %v759_v62 = vadd.f32 %v755_v59, %v2943_v55 }
 0xabb   :  { %2530 = vtanh.f32 %v758_v61  ;;  %v2163_v1 = vmul.f32 -1.442695, %v758_v61  ;;  %v2164_v4 = vmul.f32 -1.442695, %v759_v62 }
 0xabc   :  { %2532 = vtanh.f32 %v759_v62 }
 0xabd   :  { %2534 = vpow2.f32 %v2163_v1 }
 0xabe   :  { %2536 = vpow2.f32 %v2164_v4 }
 0xac5   :  { %v2531_v63 = vpop.eup %2530 }
 0xac6   :  { %v2533_v0 = vpop.eup %2532  ;;  %784 = vrot.lane.b32.xlu1 %v2531_v63, %s2776_s30 }
 0xac7   :  { %786 = vrot.lane.b32.xlu0 %v2533_v0, %s2776_s30  ;;  %v2535_v5 = vpop.eup %2534 }
 0xac8   :  { %v2537_v6 = vpop.eup %2536  ;;  %v766_v7 = vadd.f32 1.0, %v2535_v5 }
 0xac9   :  { %v767_v8 = vadd.f32 1.0, %v2537_v6 }
 0xaca   :  { %2538 = vrcp.f32 %v766_v7 }
 0xacb   :  { %2540 = vrcp.f32 %v767_v8 }
 0xad4   :  { %v2539_v9 = vpop.eup %2538 }
 0xad5   :  { %v2541_v11 = vpop.eup %2540  ;;  %v780_v18 = vmul.f32 %v2539_v9, %v776_v15 }
 0xad6   :  { %v781_v19 = vmul.f32 %v2541_v11, %v777_v16 }
 0xb38   :  { %v785_v10 = vpop.permute.xlu1 %784 }
 0xb39   :  { %v787_v12 = vpop.permute.xlu0 %786  ;;  %v790_v13 = vmul.f32 %v2539_v9, %v785_v10 }
 0xb3a   :  { %v791_v14 = vmul.f32 %v2541_v11, %v787_v12 }
 0xb3b   :  { %794 = vrot.lane.b32.xlu1 %v790_v13, %s2777_s10 }
 0xb3c   :  { %796 = vrot.lane.b32.xlu0 %v791_v14, %s2777_s10 }
 0xbad   :  { %v795_v21 = vpop.permute.xlu1 %794 }
 0xbae   :  { %v797_v23 = vpop.permute.xlu0 %796  ;;  %v800_v25 = vadd.f32 %v795_v21, %v780_v18 }
 0xbaf   :  { %v801_v28 = vadd.f32 %v797_v23, %v781_v19 }
 0xbb0   :  { %2542 = vtanh.f32 %v800_v25  ;;  %v925_v5 = vrot.slane %v800_v25, 7 }
 0xbb1   :  { %2544 = vtanh.f32 %v801_v28  ;;  %v926_v6 = vrot.slane %v801_v28, 7 }
 0xbba   :  { %v2543_v29 = vpop.eup %2542 }
 0xbbb   :  { %v2545_v31 = vpop.eup %2544  ;;  %806 = vrot.lane.b32.xlu1 %v2543_v29, %s2776_s30 }
 0xbbc   :  { %808 = vrot.lane.b32.xlu0 %v2545_v31, %s2776_s30 }
 0xc2d   :  { %v807_v32 = vpop.permute.xlu1 %806 }
 0xc2e   :  { %v809_v33 = vpop.permute.xlu0 %808  ;;  %v3024_v35 = vmul.f32 %v2539_v9, %v807_v32 }
 0xc2f   :  { %v3026_v37 = vmul.f32 %v2541_v11, %v809_v33 }
 0xc30   :  { %v825_v39 = vrot.slane %v3024_v35, 3 }
 0xc31   :  { %v826_v40 = vrot.slane %v3026_v37, 2 }
 0xc33   :  { %v827_v41 = vsel %vm381_vm2, %v826_v40, %v825_v39 }
 0xc34   :  { %828 = vrot.lane.b32.xlu1 %v827_v41, %s2777_s10 }
 0xca6   :  { %v829_v42 = vpop.permute.xlu1 %828 }
 0xca7   :  { %2317 = vmatmul.mubr.msk.f32.vlgmr.msra.gmra.mrb[4].mxu1 %vm117_vm0, %v829_v42 }
 0xca8   :  { %2440 = vmatpush3.bf16.msra.mxu1 %v2902_v22  ;;  %2338 = vmatprep.mubr.msk.f32.mxu1 %vm2774_vm1, %v2775_v27 }
 0xca9   :  { %2441 = vmatprep.subr.bf16.mxu1 %v2773_v17 }
 0xcac   :  { %2443 = vmatpush3.bf16.msra.mxu1 %v2907_v26 }
 0xd7a   :  { %v898_v43 = vpop.f32.mrb[4].mxu1 }
 0xd7b   :  { %v903_v44 = vrot.slane %v898_v43, 4  ;;  %v904_v45 = vrot.slane %v898_v43, 5  ;;  %v2318_v46 = vpop.f32.mrb[5].mxu1 }
 0xd7d   :  { %v907_v47 = vadd.f32 %v903_v44, %v2945_v57  ;;  %v908_v48 = vadd.f32 %v904_v45, %v2943_v55 }
 0xd7f   :  { %2546 = vtanh.f32 %v907_v47  ;;  %v2166_v53 = vmul.f32 -1.442695, %v907_v47  ;;  %v2167_v54 = vmul.f32 -1.442695, %v908_v48 }
 0xd80   :  { %2548 = vtanh.f32 %v908_v48 }
 0xd81   :  { %2550 = vpow2.f32 %v2166_v53 }
 0xd82   :  { %2552 = vpow2.f32 %v2167_v54 }
 0xd89   :  { %v2547_v51 = vpop.eup %2546 }
 0xd8a   :  { %v2549_v52 = vpop.eup %2548  ;;  %933 = vrot.lane.b32.xlu0 %v2547_v51, %s2776_s30 }
 0xd8b   :  { %935 = vrot.lane.b32.xlu1 %v2549_v52, %s2776_s30  ;;  %v2551_v56 = vpop.eup %2550 }
 0xd8c   :  { %v2553_v58 = vpop.eup %2552  ;;  %v915_v59 = vadd.f32 1.0, %v2551_v56 }
 0xd8d   :  { %v916_v60 = vadd.f32 1.0, %v2553_v58 }
 0xd8e   :  { %2554 = vrcp.f32 %v915_v59 }
 0xd8f   :  { %2556 = vrcp.f32 %v916_v60 }
 0xd98   :  { %v2555_v61 = vpop.eup %2554 }
 0xd99   :  { %v2557_v63 = vpop.eup %2556  ;;  %v929_v7 = vmul.f32 %v2555_v61, %v925_v5 }
 0xd9a   :  { %v930_v8 = vmul.f32 %v2557_v63, %v926_v6 }
 0xdfc   :  { %v934_v62 = vpop.permute.xlu0 %933 }
 0xdfd   :  { %v936_v0 = vpop.permute.xlu1 %935  ;;  %v939_v1 = vmul.f32 %v2555_v61, %v934_v62 }
 0xdfe   :  { %v940_v4 = vmul.f32 %v2557_v63, %v936_v0 }
 0xdff   :  { %943 = vrot.lane.b32.xlu0 %v939_v1, %s2777_s10 }
 0xe00   :  { %945 = vrot.lane.b32.xlu1 %v940_v4, %s2777_s10 }
 0xe71   :  { %v944_v9 = vpop.permute.xlu0 %943 }
 0xe72   :  { %v946_v10 = vpop.permute.xlu1 %945  ;;  %v949_v11 = vadd.f32 %v944_v9, %v929_v7 }
 0xe73   :  { %v950_v12 = vadd.f32 %v946_v10, %v930_v8 }
 0xe74   :  { %2558 = vtanh.f32 %v949_v11  ;;  %v1074_v56 = vrot.slane %v949_v11, 7 }
 0xe75   :  { %2560 = vtanh.f32 %v950_v12  ;;  %v1075_v58 = vrot.slane %v950_v12, 7 }
 0xe7e   :  { %v2559_v13 = vpop.eup %2558 }
 0xe7f   :  { %v2561_v14 = vpop.eup %2560  ;;  %955 = vrot.lane.b32.xlu0 %v2559_v13, %s2776_s30 }
 0xe80   :  { %957 = vrot.lane.b32.xlu1 %v2561_v14, %s2776_s30 }
 0xef1   :  { %v956_v15 = vpop.permute.xlu0 %955 }
 0xef2   :  { %v958_v16 = vpop.permute.xlu1 %957  ;;  %v3046_v18 = vmul.f32 %v2555_v61, %v956_v15 }
 0xef3   :  { %v3048_v19 = vmul.f32 %v2557_v63, %v958_v16 }
 0xef4   :  { %v974_v21 = vrot.slane %v3046_v18, 4 }
 0xef5   :  { %v975_v23 = vrot.slane %v3048_v19, 3 }
 0xef7   :  { %v976_v25 = vsel %vm381_vm2, %v975_v23, %v974_v21 }
 0xef8   :  { %977 = vrot.lane.b32.xlu0 %v976_v25, %s2777_s10 }
 0xf6a   :  { %v978_v28 = vpop.permute.xlu0 %977 }
 0xf6b   :  { %2328 = vmatmul.mubr.msk.f32.vlgmr.msra.gmra.mrb[6].mxu0 %vm117_vm0, %v978_v28 }
 0xf6c   :  { %2446 = vmatpush3.bf16.msra.mxu0 %v2902_v22  ;;  %2349 = vmatprep.mubr.msk.f32.mxu0 %vm2774_vm1, %v2775_v27 }
 0xf6d   :  { %2447 = vmatprep.subr.bf16.mxu0 %v2773_v17 }
 0xf70   :  { %2449 = vmatpush3.bf16.msra.mxu0 %v2907_v26 }
 0xf71   :  { %2373 = vmatprep.subr.mxu0 %v2775_v27 }
0x103e   :  { %v1047_v29 = vpop.f32.mrb[6].mxu0 }
0x103f   :  { %v1052_v31 = vrot.slane %v1047_v29, 3  ;;  %v1053_v32 = vrot.slane %v1047_v29, 4  ;;  %v2329_v33 = vpop.f32.mrb[7].mxu0 }
0x1041   :  { %v1056_v39 = vadd.f32 %v1052_v31, %v2945_v57  ;;  %v1057_v40 = vadd.f32 %v1053_v32, %v2943_v55 }
0x1043   :  { %2562 = vtanh.f32 %v1056_v39  ;;  %v2169_v42 = vmul.f32 -1.442695, %v1056_v39  ;;  %v2170_v26 = vmul.f32 -1.442695, %v1057_v40 }
0x1044   :  { %2564 = vtanh.f32 %v1057_v40 }
0x1045   :  { %2566 = vpow2.f32 %v2169_v42 }
0x1046   :  { %2568 = vpow2.f32 %v2170_v26 }
0x104d   :  { %v2563_v22 = vpop.eup %2562 }
0x104e   :  { %v2565_v41 = vpop.eup %2564  ;;  %1082 = vrot.lane.b32.xlu1 %v2563_v22, %s2776_s30 }
0x104f   :  { %1084 = vrot.lane.b32.xlu0 %v2565_v41, %s2776_s30  ;;  %v2567_v43 = vpop.eup %2566 }
0x1050   :  { %v2569_v44 = vpop.eup %2568  ;;  %v1064_v45 = vadd.f32 1.0, %v2567_v43 }
0x1051   :  { %v1065_v46 = vadd.f32 1.0, %v2569_v44 }
0x1052   :  { %2570 = vrcp.f32 %v1064_v45 }
0x1053   :  { %2572 = vrcp.f32 %v1065_v46 }
0x105c   :  { %v2571_v47 = vpop.eup %2570 }
0x105d   :  { %v2573_v51 = vpop.eup %2572  ;;  %v1078_v59 = vmul.f32 %v2571_v47, %v1074_v56 }
0x105e   :  { %v1079_v60 = vmul.f32 %v2573_v51, %v1075_v58 }
0x10c0   :  { %v1083_v48 = vpop.permute.xlu1 %1082 }
0x10c1   :  { %v1085_v52 = vpop.permute.xlu0 %1084  ;;  %v1088_v53 = vmul.f32 %v2571_v47, %v1083_v48 }
0x10c2   :  { %v1089_v54 = vmul.f32 %v2573_v51, %v1085_v52 }
0x10c3   :  { %1092 = vrot.lane.b32.xlu1 %v1088_v53, %s2777_s10 }
0x10c4   :  { %1094 = vrot.lane.b32.xlu0 %v1089_v54, %s2777_s10 }
0x1135   :  { %v1093_v61 = vpop.permute.xlu1 %1092 }
0x1136   :  { %v1095_v62 = vpop.permute.xlu0 %1094  ;;  %v1098_v63 = vadd.f32 %v1093_v61, %v1078_v59 }
0x1137   :  { %v1099_v0 = vadd.f32 %v1095_v62, %v1079_v60 }
0x1138   :  { %2574 = vtanh.f32 %v1098_v63  ;;  %v1223_v45 = vrot.slane %v1098_v63, 7 }
0x1139   :  { %2576 = vtanh.f32 %v1099_v0  ;;  %v1224_v46 = vrot.slane %v1099_v0, 7 }
0x1142   :  { %v2575_v1 = vpop.eup %2574 }
0x1143   :  { %v2577_v4 = vpop.eup %2576  ;;  %1104 = vrot.lane.b32.xlu1 %v2575_v1, %s2776_s30 }
0x1144   :  { %1106 = vrot.lane.b32.xlu0 %v2577_v4, %s2776_s30 }
0x11b5   :  { %v1105_v5 = vpop.permute.xlu1 %1104 }
0x11b6   :  { %v1107_v6 = vpop.permute.xlu0 %1106  ;;  %v3069_v7 = vmul.f32 %v2571_v47, %v1105_v5 }
0x11b7   :  { %v3071_v8 = vmul.f32 %v2573_v51, %v1107_v6 }
0x11b8   :  { %v1123_v9 = vrot.slane %v3069_v7, 5 }
0x11b9   :  { %v1124_v10 = vrot.slane %v3071_v8, 4 }
0x11bb   :  { %v1125_v11 = vsel %vm381_vm2, %v1124_v10, %v1123_v9 }
0x11bc   :  { %1126 = vrot.lane.b32.xlu1 %v1125_v11, %s2777_s10 }
0x122e   :  { %v1127_v12 = vpop.permute.xlu1 %1126 }
0x122f   :  { %2339 = vmatmul.mubr.msk.f32.vlgmr.msra.gmra.mrb[6].mxu1 %vm117_vm0, %v1127_v12 }
0x1302   :  { %v1196_v13 = vpop.f32.mrb[6].mxu1 }
0x1303   :  { %v1201_v14 = vrot.slane %v1196_v13, 2  ;;  %v1202_v15 = vrot.slane %v1196_v13, 3  ;;  %v2340_v16 = vpop.f32.mrb[7].mxu1 }
0x1305   :  { %v1205_v21 = vadd.f32 %v1201_v14, %v2945_v57  ;;  %v1206_v23 = vadd.f32 %v1202_v15, %v2943_v55 }
0x1307   :  { %2578 = vtanh.f32 %v1205_v21  ;;  %v2172_v29 = vmul.f32 -1.442695, %v1205_v21  ;;  %v2173_v31 = vmul.f32 -1.442695, %v1206_v23 }
0x1308   :  { %2580 = vtanh.f32 %v1206_v23 }
0x1309   :  { %2582 = vpow2.f32 %v2172_v29 }
0x130a   :  { %2584 = vpow2.f32 %v2173_v31 }
0x1311   :  { %v2579_v25 = vpop.eup %2578 }
0x1312   :  { %v2581_v28 = vpop.eup %2580  ;;  %1231 = vrot.lane.b32.xlu0 %v2579_v25, %s2776_s30 }
0x1313   :  { %1233 = vrot.lane.b32.xlu1 %v2581_v28, %s2776_s30  ;;  %v2583_v32 = vpop.eup %2582 }
0x1314   :  { %v2585_v33 = vpop.eup %2584  ;;  %v1213_v39 = vadd.f32 1.0, %v2583_v32 }
0x1315   :  { %v1214_v40 = vadd.f32 1.0, %v2585_v33 }
0x1316   :  { %2586 = vrcp.f32 %v1213_v39 }
0x1317   :  { %2588 = vrcp.f32 %v1214_v40 }
0x1320   :  { %v2587_v22 = vpop.eup %2586 }
0x1321   :  { %v2589_v42 = vpop.eup %2588  ;;  %v1227_v47 = vmul.f32 %v2587_v22, %v1223_v45 }
0x1322   :  { %v1228_v48 = vmul.f32 %v2589_v42, %v1224_v46 }
0x1384   :  { %v1232_v41 = vpop.permute.xlu0 %1231 }
0x1385   :  { %v1234_v26 = vpop.permute.xlu1 %1233  ;;  %v1237_v43 = vmul.f32 %v2587_v22, %v1232_v41 }
0x1386   :  { %v1238_v44 = vmul.f32 %v2589_v42, %v1234_v26 }
0x1387   :  { %1241 = vrot.lane.b32.xlu0 %v1237_v43, %s2777_s10 }
0x1388   :  { %1243 = vrot.lane.b32.xlu1 %v1238_v44, %s2777_s10 }
0x13f9   :  { %v1242_v51 = vpop.permute.xlu0 %1241 }
0x13fa   :  { %v1244_v52 = vpop.permute.xlu1 %1243  ;;  %v1247_v53 = vadd.f32 %v1242_v51, %v1227_v47 }
0x13fb   :  { %v1248_v54 = vadd.f32 %v1244_v52, %v1228_v48 }
0x13fc   :  { %2590 = vtanh.f32 %v1247_v53  ;;  %v1372_v39 = vrot.slane %v1247_v53, 7 }
0x13fd   :  { %2592 = vtanh.f32 %v1248_v54  ;;  %v1373_v40 = vrot.slane %v1248_v54, 7 }
0x1406   :  { %v2591_v56 = vpop.eup %2590 }
0x1407   :  { %v2593_v58 = vpop.eup %2592  ;;  %1253 = vrot.lane.b32.xlu0 %v2591_v56, %s2776_s30 }
0x1408   :  { %1255 = vrot.lane.b32.xlu1 %v2593_v58, %s2776_s30 }
0x1479   :  { %v1254_v59 = vpop.permute.xlu0 %1253 }
0x147a   :  { %v1256_v60 = vpop.permute.xlu1 %1255  ;;  %v1259_v61 = vmul.f32 %v2587_v22, %v1254_v59 }
0x147b   :  { %v3086_v62 = vmul.f32 %v2589_v42, %v1256_v60 }
0x147c   :  { %v1272_v63 = vrot.slane %v1259_v61, 6 }
0x147d   :  { %v1273_v0 = vrot.slane %v3086_v62, 5 }
0x147f   :  { %v1274_v1 = vsel %vm381_vm2, %v1273_v0, %v1272_v63 }
0x1480   :  { %1275 = vrot.lane.b32.xlu0 %v1274_v1, %s2777_s10 }
0x14f2   :  { %v1276_v4 = vpop.permute.xlu0 %1275 }
0x14f3   :  { %2350 = vmatmul.mubr.msk.f32.vlgmr.msra.gmra.mrb[8].mxu0 %vm117_vm0, %v1276_v4 }
0x14f4   :  { %2375 = vmatprep.mubr.msk.f32.mxu0 %vm2774_vm1, %v2775_v27 }
0x15c6   :  { %v1345_v5 = vpop.f32.mrb[8].mxu0 }
0x15c7   :  { %v1350_v6 = vrot.slane %v1345_v5, 1  ;;  %v1351_v9 = vrot.slane %v1345_v5, 2  ;;  %v2351_v10 = vpop.f32.mrb[9].mxu0 }
0x15c9   :  { %v1354_v11 = vadd.f32 %v1350_v6, %v2945_v57  ;;  %v1355_v12 = vadd.f32 %v1351_v9, %v2943_v55 }
0x15cb   :  { %2594 = vtanh.f32 %v1354_v11  ;;  %v2175_v15 = vmul.f32 -1.442695, %v1354_v11  ;;  %v2176_v16 = vmul.f32 -1.442695, %v1355_v12 }
0x15cc   :  { %2596 = vtanh.f32 %v1355_v12 }
0x15cd   :  { %2598 = vpow2.f32 %v2175_v15 }
0x15ce   :  { %2600 = vpow2.f32 %v2176_v16  ;;  %v113_v16 = vld [vmem:[#allocation11 + $0x10] sm:$0xff] }
0x15d5   :  { %v2595_v13 = vpop.eup %2594 }
0x15d6   :  { %v2597_v14 = vpop.eup %2596  ;;  %1380 = vrot.lane.b32.xlu1 %v2595_v13, %s2776_s30  ;;  %v111_v13 = vld [vmem:[#allocation11] sm:$0xff] }
0x15d7   :  { %1382 = vrot.lane.b32.xlu0 %v2597_v14, %s2776_s30  ;;  %v2599_v21 = vpop.eup %2598  ;;  %v112_v14 = vld [vmem:[#allocation11 + $0x8] sm:$0xff] }
0x15d8   :  { %v2601_v23 = vpop.eup %2600  ;;  %v1362_v25 = vadd.f32 1.0, %v2599_v21  ;;  %v2450_v15 = vpack.c.bf16 %v112_v14, %v111_v13  ;;  %v114_v21 = vld [vmem:[#allocation11 + $0x18] sm:$0xff] }
0x15d9   :  { %v1363_v28 = vadd.f32 1.0, %v2601_v23  ;;  %v2454_v23 = vpack.c.bf16 %v114_v21, %v113_v16 }
0x15da   :  { %2602 = vrcp.f32 %v1362_v25  ;;  %2451 = vmatprep.subr.bf16.mxu1 %v2450_v15 }
0x15db   :  { %2604 = vrcp.f32 %v1363_v28  ;;  %2453 = vmatpush3.bf16.msra.mxu1 %v2450_v15 }
0x15dc   :  { %2455 = vmatprep.subr.bf16.mxu1 %v2454_v23 }
0x15df   :  { %2457 = vmatpush3.bf16.msra.mxu1 %v2454_v23 }
0x15e0   :  { %2363 = vmatprep.subr.mxu1 %v2775_v27 }
0x15e4   :  { %v2603_v57 = vpop.eup %2602 }
0x15e5   :  { %v2605_v29 = vpop.eup %2604  ;;  %v1376_v22 = vmul.f32 %v2603_v57, %v1372_v39  ;;  %v1469_v39 = vsub.s32 5, %v2921_v34 }
0x15e6   :  { %v1377_v41 = vmul.f32 %v2605_v29, %v1373_v40  ;;  %v1457_v40 = vsub.s32 3, %v2921_v34 }
0x1648   :  { %v1381_v55 = vpop.permute.xlu1 %1380 }
0x1649   :  { %v1383_v31 = vpop.permute.xlu0 %1382  ;;  %v1386_v32 = vmul.f32 %v2603_v57, %v1381_v55 }
0x164a   :  { %v1387_v33 = vmul.f32 %v2605_v29, %v1383_v31 }
0x164b   :  { %1390 = vrot.lane.b32.xlu1 %v1386_v32, %s2777_s10  ;;  %v1463_v32 = vsub.s32 4, %v2921_v34 }
0x164c   :  { %1392 = vrot.lane.b32.xlu0 %v1387_v33, %s2777_s10  ;;  %v1451_v33 = vsub.s32 2, %v2921_v34 }
0x16bd   :  { %v1391_v42 = vpop.permute.xlu1 %1390 }
0x16be   :  { %v1393_v26 = vpop.permute.xlu0 %1392  ;;  %v1396_v43 = vadd.f32 %v1391_v42, %v1376_v22  ;;  %v3154_v22 = vld [vmem:[#allocation8] sm:$0xff] }
0x16bf   :  { %v1397_v44 = vadd.f32 %v1393_v26, %v1377_v41  ;;  %v1464_v41 = vrot.slane %v3154_v22, %v1463_v32  ;;  %v1452_v42 = vrot.slane %v3154_v22, %v1451_v33 }
0x16c0   :  { %2606 = vtanh.f32 %v1396_v43  ;;  %v3162_v43 = vld [vmem:[#allocation8 + $0x8] sm:$0xff] }
0x16c1   :  { %2608 = vtanh.f32 %v1397_v44 }
0x16ca   :  { %v2607_v45 = vpop.eup %2606 }
0x16cb   :  { %v2609_v46 = vpop.eup %2608  ;;  %1402 = vrot.lane.b32.xlu1 %v2607_v45, %s2776_s30  ;;  %v1470_v45 = vrot.slane %v3154_v22, %v1469_v39 }
0x16cc   :  { %1404 = vrot.lane.b32.xlu0 %v2609_v46, %s2776_s30  ;;  %v1458_v46 = vrot.slane %v3154_v22, %v1457_v40 }
0x16cf   :  { %371 = vrot.lane.b32.xlu1 %v2958_v24, %s2777_s10 }
0x16d0   :  { %519 = vrot.lane.b32.xlu0 %v2978_v2, %s2777_s10 }
0x16d3   :  { %667 = vrot.lane.b32.xlu1 %v3001_v49, %s2777_s10 }
0x16d4   :  { %816 = vrot.lane.b32.xlu0 %v3024_v35, %s2777_s10 }
0x16d7   :  { %965 = vrot.lane.b32.xlu1 %v3046_v18, %s2777_s10 }
0x16d8   :  { %1114 = vrot.lane.b32.xlu0 %v3069_v7, %s2777_s10 }
0x16db   :  { %1263 = vrot.lane.b32.xlu1 %v1259_v61, %s2777_s10 }
0x16dc   :  { %521 = vrot.lane.b32.xlu0 %v2980_v3, %s2777_s10 }
0x16df   :  { %373 = vrot.lane.b32.xlu1 %v2955_v20, %s2777_s10 }
0x16e0   :  { %818 = vrot.lane.b32.xlu0 %v3026_v37, %s2777_s10 }
0x16e3   :  { %669 = vrot.lane.b32.xlu1 %v3003_v50, %s2777_s10 }
0x16e4   :  { %1116 = vrot.lane.b32.xlu0 %v3071_v8, %s2777_s10 }
0x16e7   :  { %967 = vrot.lane.b32.xlu1 %v3048_v19, %s2777_s10 }
0x16eb   :  { %1265 = vrot.lane.b32.xlu1 %v3086_v62, %s2777_s10 }
0x173d   :  { %v1403_v24 = vpop.permute.xlu1 %1402 }
0x173e   :  { %v1405_v2 = vpop.permute.xlu0 %1404  ;;  %v1408_v3 = vmul.f32 %v2603_v57, %v1403_v24  ;;  %v1604_v24 = vsub.s32 7, %v2921_v34 }
0x173f   :  { %v1409_v49 = vmul.f32 %v2605_v29, %v1405_v2 }
0x1740   :  { %1412 = vrot.lane.b32.xlu0 %v1408_v3, %s2777_s10 }
0x1741   :  { %v372_v20 = vpop.permute.xlu1 %371 }
0x1742   :  { %v520_v35 = vpop.permute.xlu0 %519  ;;  %378 = vst.msk [vmem:[#allocation2] sm:$0x1] %vm377_vm3, %v372_v20  ;;  %v1611_v20 = vrot.slane %v3162_v43, %v2924_v36 }
0x1743   :  { %526 = vst.msk [vmem:[#allocation2] sm:$0x2] %vm525_vm4, %v520_v35 }
0x1744   :  { %1414 = vrot.lane.b32.xlu0 %v1409_v49, %s2777_s10 }
0x1745   :  { %v668_v50 = vpop.permute.xlu1 %667 }
0x1746   :  { %v817_v37 = vpop.permute.xlu0 %816  ;;  %674 = vst.msk [vmem:[#allocation2] sm:$0x4] %vm673_vm5, %v668_v50 }
0x1747   :  { %823 = vst.msk [vmem:[#allocation2] sm:$0x8] %vm822_vm6, %v817_v37 }
0x1749   :  { %v966_v18 = vpop.permute.xlu1 %965 }
0x174a   :  { %v1115_v19 = vpop.permute.xlu0 %1114  ;;  %972 = vst.msk [vmem:[#allocation2] sm:$0x10] %vm971_vm7, %v966_v18  ;;  %v1605_v18 = vrot.slane %v3154_v22, %v1604_v24 }
0x174b   :  { %1121 = vst.msk [vmem:[#allocation2] sm:$0x20] %vm1120_vm8, %v1115_v19 }
0x174d   :  { %v1264_v7 = vpop.permute.xlu1 %1263 }
0x174e   :  { %v522_v8 = vpop.permute.xlu0 %521  ;;  %1270 = vst.msk [vmem:[#allocation2] sm:$0x40] %vm1269_vm9, %v1264_v7 }
0x174f   :  { %527 = vst.msk [vmem:[#allocation2 + $0x8] sm:$0x2] %vm525_vm4, %v522_v8 }
0x1751   :  { %v374_v47 = vpop.permute.xlu1 %373 }
0x1752   :  { %v819_v48 = vpop.permute.xlu0 %818  ;;  %379 = vst.msk [vmem:[#allocation2 + $0x8] sm:$0x1] %vm377_vm3, %v374_v47 }
0x1753   :  { %824 = vst.msk [vmem:[#allocation2 + $0x8] sm:$0x8] %vm822_vm6, %v819_v48 }
0x1755   :  { %v670_v51 = vpop.permute.xlu1 %669 }
0x1756   :  { %v1117_v52 = vpop.permute.xlu0 %1116  ;;  %675 = vst.msk [vmem:[#allocation2 + $0x8] sm:$0x4] %vm673_vm5, %v670_v51 }
0x1757   :  { %1122 = vst.msk [vmem:[#allocation2 + $0x8] sm:$0x20] %vm1120_vm8, %v1117_v52 }
0x1759   :  { %v968_v53 = vpop.permute.xlu1 %967 }
0x175a   :  { %973 = vst.msk [vmem:[#allocation2 + $0x8] sm:$0x10] %vm971_vm7, %v968_v53  ;;  %v1476_v53 = vrot.slane %v3162_v43, %v2927_v38 }
0x175d   :  { %v1266_v54 = vpop.permute.xlu1 %1265 }
0x175e   :  { %1271 = vst.msk [vmem:[#allocation2 + $0x8] sm:$0x40] %vm1269_vm9, %v1266_v54 }
0x17b2   :  { %v1413_v56 = vpop.permute.xlu0 %1412 }
0x17b3   :  { %1419 = vst.msk [vmem:[#allocation2] sm:$0x80] %vm1418_vm10, %v1413_v56 }
0x17b6   :  { %v1415_v58 = vpop.permute.xlu0 %1414 }
0x17b7   :  { %1420 = vst.msk [vmem:[#allocation2 + $0x8] sm:$0x80] %vm1418_vm10, %v1415_v58 }
0x17ba   :  { %v1421_v59 = vld [vmem:[#allocation2] sm:$0xff] }
0x17bb   :  { %v1423_v60 = vsel %vm117_vm0, %v1421_v59, 0.0 }
0x17bc   :  { %1424 = vadd.xlane.f32.xlu1 %v1423_v60 }
0x17be   :  { %v1422_v61 = vld [vmem:[#allocation2 + $0x8] sm:$0xff] }
0x17bf   :  { %v1426_v62 = vsel %vm117_vm0, %v1422_v61, 0.0 }
0x17c0   :  { %1427 = vadd.xlane.f32.xlu0 %v1426_v62 }
0x1849   :  { %v1425_v63 = vpop.xlane.xlu1 %1424 }
0x184a   :  { %v1429_v0 = vmul.f32 0.03125, %v1425_v63 }
0x184c   :  { %v1431_v1 = vsub.f32 %v1421_v59, %v1429_v0 }
0x184d   :  { %v1428_v4 = vpop.xlane.xlu0 %1427 }
0x184e   :  { %v1430_v5 = vmul.f32 0.03125, %v1428_v4  ;;  %v1433_v6 = vmul.f32 %v1431_v1, %v1431_v1 }
0x1850   :  { %v1432_v9 = vsub.f32 %v1422_v61, %v1430_v5  ;;  %v1435_v10 = vsel %vm117_vm0, %v1433_v6, 0.0 }
0x1851   :  { %1436 = vadd.xlane.f32.xlu0 %v1435_v10 }
0x1852   :  { %v1434_v11 = vmul.f32 %v1432_v9, %v1432_v9 }
0x1854   :  { %v1438_v12 = vsel %vm117_vm0, %v1434_v11, 0.0 }
0x1855   :  { %1439 = vadd.xlane.f32.xlu0 %v1438_v12 }
0x18de   :  { %v1437_v25 = vpop.xlane.xlu0 %1436 }
0x18df   :  { %v1441_v28 = vmul.f32 0.03125, %v1437_v25  ;;  %v1587_v25 = vrot.slane %v3162_v43, %v1451_v33 }
0x18e1   :  { %v1443_v57 = vadd.f32 1e-05, %v1441_v28  ;;  %v1598_v28 = vsub.s32 6, %v2921_v34 }
0x18e2   :  { %v1440_v55 = vpop.xlane.xlu0 %1439 }
0x18e3   :  { %2610 = vrsqrt.f32 %v1443_v57  ;;  %v1442_v29 = vmul.f32 0.03125, %v1440_v55 }
0x18e5   :  { %v1444_v31 = vadd.f32 1e-05, %v1442_v29  ;;  %v1593_v29 = vrot.slane %v3162_v43, %v1457_v40  ;;  %v1769_v40 = vand.u32 127, %v145_v30 }
0x18e7   :  { %2612 = vrsqrt.f32 %v1444_v31  ;;  %vm1770_vm11 = vcmp.gt.s32.totalorder %v1769_v40, %v2921_v34 }
0x18ed   :  { %v2611_v26 = vpop.eup %2610 }
0x18ee   :  { %v1447_v44 = vmul.f32 %v2611_v26, %v1431_v1  ;;  %v1599_v26 = vrot.slane %v3154_v22, %v1598_v28 }
0x18f0   :  { %v1465_v2 = vmul.f32 %v1464_v41, %v1447_v44  ;;  %v1453_v3 = vmul.f32 %v1452_v42, %v1447_v44 }
0x18f1   :  { %v2613_v49 = vpop.eup %2612 }
0x18f2   :  { %v1448_v35 = vmul.f32 %v2613_v49, %v1432_v9  ;;  %v3173_v50 = vadd.f32 %v1470_v45, %v1465_v2  ;;  %v1459_v37 = vadd.f32 %v1458_v46, %v1453_v3 }
0x18f4   :  { %v1466_v19 = vmul.f32 %v1464_v41, %v1448_v35  ;;  %2360 = vmatprep.mubr.msk.f32.mxu1 %vm117_vm0, %v3173_v50  ;;  %v1454_v7 = vmul.f32 %v1452_v42, %v1448_v35  ;;  %v1612_v8 = vmul.f32 %v1611_v20, %v1459_v37  ;;  %v1606_v36 = vmul.f32 %v1605_v18, %v1459_v37 }
0x18f6   :  { %v3180_v47 = vadd.f32 %v1470_v45, %v1466_v19  ;;  %v1460_v48 = vadd.f32 %v1458_v46, %v1454_v7  ;;  %2374 = vmatpush3.msra.mxu0 %v1612_v8 }
0x18f7   :  { %2458 = vmatprep.subr.bf16.mxu0 %v2773_v17 }
0x18f8   :  { %2361 = vmatmul.mubr.msk.f32.vlgmr.msra.gmra.mrb[8].mxu1 %vm117_vm0, %v3180_v47  ;;  %v1607_v51 = vmul.f32 %v1605_v18, %v1460_v48  ;;  %v1613_v52 = vmul.f32 %v1611_v20, %v1460_v48 }
0x18f9   :  { %2364 = vmatpush3.xpose.msk.msra.mxu1 %vm117_vm0, %v1606_v36  ;;  %2365 = vmatprep.mubr.msk.f32.mxu1 %vm2774_vm1, %v2775_v27 }
0x18fa   :  { %2368 = vmatprep.subr.mxu1 %v2775_v27 }
0x19cb   :  { %v2362_v54 = vpop.f32.mrb[8].mxu1 }
0x19cc   :  { %v1555_v56 = vadd.f32 %v2362_v54, %v1476_v53  ;;  %v1549_v58 = vpop.f32.mrb[9].mxu1 }
0x19cd   :  { %v1550_v59 = vadd.f32 %v1549_v58, %v1476_v53 }
0x19ce   :  { %v1561_v60 = vsel %vm117_vm0, %v1555_v56, 0.0 }
0x19cf   :  { %1562 = vadd.xlane.f32.xlu0 %v1561_v60  ;;  %v1558_v61 = vsel %vm117_vm0, %v1550_v59, 0.0 }
0x19d0   :  { %1559 = vadd.xlane.f32.xlu1 %v1558_v61 }
0x1a5c   :  { %v1563_v62 = vpop.xlane.xlu0 %1562 }
0x1a5d   :  { %v1565_v63 = vmul.f32 0.03125, %v1563_v62  ;;  %v1560_v0 = vpop.xlane.xlu1 %1559 }
0x1a5e   :  { %v1564_v1 = vmul.f32 0.03125, %v1560_v0 }
0x1a5f   :  { %v1567_v4 = vsub.f32 %v1555_v56, %v1565_v63 }
0x1a60   :  { %v1566_v5 = vsub.f32 %v1550_v59, %v1564_v1 }
0x1a61   :  { %v1569_v6 = vmul.f32 %v1567_v4, %v1567_v4 }
0x1a62   :  { %v1568_v9 = vmul.f32 %v1566_v5, %v1566_v5 }
0x1a63   :  { %v1573_v10 = vsel %vm117_vm0, %v1569_v6, 0.0 }
0x1a64   :  { %1574 = vadd.xlane.f32.xlu0 %v1573_v10  ;;  %v1570_v11 = vsel %vm117_vm0, %v1568_v9, 0.0 }
0x1a65   :  { %1571 = vadd.xlane.f32.xlu1 %v1570_v11 }
0x1af1   :  { %v1575_v12 = vpop.xlane.xlu0 %1574 }
0x1af2   :  { %v1577_v13 = vmul.f32 0.03125, %v1575_v12  ;;  %v1572_v14 = vpop.xlane.xlu1 %1571 }
0x1af3   :  { %v1576_v15 = vmul.f32 0.03125, %v1572_v14 }
0x1af4   :  { %v1579_v16 = vadd.f32 1e-05, %v1577_v13 }
0x1af5   :  { %v1578_v21 = vadd.f32 1e-05, %v1576_v15 }
0x1af6   :  { %2614 = vrsqrt.f32 %v1579_v16 }
0x1af7   :  { %2616 = vrsqrt.f32 %v1578_v21 }
0x1b00   :  { %v2615_v23 = vpop.eup %2614 }
0x1b01   :  { %v2617_v57 = vpop.eup %2616  ;;  %v1583_v55 = vmul.f32 %v2615_v23, %v1567_v4 }
0x1b02   :  { %v1582_v31 = vmul.f32 %v2617_v57, %v1566_v5 }
0x1b03   :  { %v1589_v41 = vmul.f32 %v1587_v25, %v1583_v55  ;;  %v109_v55 = vld [vmem:[#allocation10 + $0x50] sm:$0xff] }
0x1b04   :  { %v1588_v42 = vmul.f32 %v1587_v25, %v1582_v31  ;;  %v107_v25 = vld [vmem:[#allocation10 + $0x40] sm:$0xff] }
0x1b05   :  { %v1595_v46 = vadd.f32 %v1593_v29, %v1589_v41 }
0x1b06   :  { %v1594_v44 = vadd.f32 %v1593_v29, %v1588_v42  ;;  %v110_v29 = vld [vmem:[#allocation10 + $0x58] sm:$0xff] }
0x1b07   :  { %v1601_v33 = vmul.f32 %v1599_v26, %v1595_v46  ;;  %v2462_v31 = vpack.c.bf16 %v110_v29, %v109_v55  ;;  %v1987_v55 = vrot.slane %v3162_v43, %v1598_v28 }
0x1b08   :  { %v1600_v45 = vmul.f32 %v1599_v26, %v1594_v44 }
0x1b0a   :  { %2366 = vmatmul.mubr.msk.f32.vlgmr.msra.gmra.mrb[10].mxu1 %vm117_vm0, %v1600_v45 }
0x1b0b   :  { %2369 = vmatpush3.xpose.msk.msra.mxu1 %vm117_vm0, %v1607_v51  ;;  %2370 = vmatprep.mubr.msk.f32.mxu1 %vm2774_vm1, %v2775_v27 }
0x1b0c   :  { %2378 = vmatprep.subr.mxu1 %v2775_v27 }
0x1b0e   :  { %2371 = vmatmul.mubr.msk.f32.vlgmr.msra.gmra.mrb[12].mxu1 %vm117_vm0, %v1601_v33  ;;  %v1975_v33 = vrot.slane %v3162_v43, %v1463_v32 }
0x1b0f   :  { %2379 = vmatpush3.msra.mxu1 %v1613_v52  ;;  %2380 = vmatprep.mubr.msk.f32.mxu1 %vm2774_vm1, %v2775_v27 }
0x1bdd   :  { %v1686_v22 = vpop.f32.mrb[10].mxu1 }
0x1bde   :  { %v1773_v2 = vsel %vm1770_vm11, -inf, %v1686_v22  ;;  %v2367_v3 = vpop.f32.mrb[11].mxu1 }
0x1bdf   :  { %v1776_v20 = vsel %vm1775_vm12, %v1773_v2, -inf }
0x1be0   :  { %1777 = vmax.xlane.f32.xlu1 %v1776_v20  ;;  %v2000_v20 = vstv %s1999_s11 }
0x1be1   :  { %v1762_v49 = vpop.f32.mrb[12].mxu1 }
0x1be2   :  { %v1774_v35 = vsel %vm1770_vm11, -inf, %v1762_v49  ;;  %v2372_v37 = vpop.f32.mrb[13].mxu1 }
0x1be3   :  { %v1779_v18 = vsel %vm1775_vm12, %v1774_v35, -inf }
0x1be4   :  { %1780 = vmax.xlane.f32.xlu0 %v1779_v18 }
0x1c6d   :  { %v1778_v19 = vpop.xlane.xlu1 %1777 }
0x1c6e   :  { %v1782_v7 = vsub.f32 %v1773_v2, %v1778_v19  ;;  %v1997_v19 = vstv %s3275_s6  ;;  %s2779_s6 = smov [#allocation14]  }
0x1c6f   :  { %s2137_s17 = sshll.u32 %s2779_s6, 4  ;;  %s2138_s17 = int_to_ptr.vmem [resolvable:$true] %s2137_s17 }
0x1c70   :  { %v1784_v8 = vmul.f32 1.442695, %v1782_v7  ;;  %v2004_v7 = vstv %s2185_s12  ;;  %s2734_s18 = scalar_lea.vmem %s2138_s17, 256  ;;  %p2739_p10 = scmp.lt.s32.totalorder %s2138_s17, %s2138_s17 }
0x1c71   :  { %v1781_v48 = vpop.xlane.xlu0 %1780  ;;  %p2735_p9 = scmp.ne.s32.totalorder %s2138_s17, %s2734_s18  ;;  %p2740_p11 = scmp.lt.s32.totalorder %s2734_s18, %s2734_s18 }
0x1c72   :  { %2618 = vpow2.f32 %v1784_v8  ;;  %v1783_v30 = vsub.f32 %v1774_v35, %v1781_v48 }
0x1c73   :  { %p2741_p12 = por %p2740_p11, %p2739_p10 }
0x1c74   :  { %v1786_v36 = vmul.f32 1.442695, %v1783_v30 }
0x1c75   :  { %p2742_p13 = pnand %p2741_p12, %p2735_p9 }
0x1c76   :  { %2620 = vpow2.f32 %v1786_v36 }
0x1c7c   :  { %v2619_v51 = vpop.eup %2618 }
0x1c7d   :  { %v1788_v52 = vsel %vm1775_vm12, %v2619_v51, 0.0 }
0x1c7e   :  { %1789 = vadd.xlane.f32.xlu1 %v1788_v52 }
0x1c80   :  { %v2621_v53 = vpop.eup %2620 }
0x1c81   :  { %v1791_v54 = vsel %vm1775_vm12, %v2621_v53, 0.0 }
0x1c82   :  { %1792 = vadd.xlane.f32.xlu0 %v1791_v54 }
0x1d0b   :  { %v1790_v56 = vpop.xlane.xlu1 %1789 }
0x1d0c   :  { %2622 = vrcp.f32 %v1790_v56 }
0x1d0f   :  { %v1793_v58 = vpop.xlane.xlu0 %1792 }
0x1d10   :  { %2624 = vrcp.f32 %v1793_v58 }
0x1d16   :  { %v2623_v59 = vpop.eup %2622 }
0x1d17   :  { %v1796_v60 = vmul.f32 %v2623_v59, %v2619_v51 }
0x1d19   :  { %2376 = vmatmul.mubr.msk.f32.vlgmr.msra.gmra.mrb[10].mxu0 %vm1775_vm12, %v1796_v60 }
0x1d1a   :  { %v2625_v61 = vpop.eup %2624  ;;  %2391 = vmatprep.mubr.msk.f32.mxu0 %vm2774_vm1, %v2775_v27 }
0x1d1b   :  { %v1797_v62 = vmul.f32 %v2625_v61, %v2621_v53 }
0x1d1d   :  { %2381 = vmatmul.mubr.msk.f32.vlgmr.msra.gmra.mrb[14].mxu1 %vm1775_vm12, %v1797_v62 }
0x1dec   :  { %v1867_v63 = vpop.f32.mrb[10].mxu0 }
0x1ded   :  { %v1944_v0 = vadd.f32 %v1867_v63, %v3173_v50  ;;  %v2377_v1 = vpop.f32.mrb[11].mxu0 }
0x1def   :  { %v1946_v4 = vsel %vm117_vm0, %v1944_v0, 0.0 }
0x1df0   :  { %v1940_v5 = vpop.f32.mrb[14].mxu1  ;;  %1947 = vadd.xlane.f32.xlu1 %v1946_v4 }
0x1df1   :  { %v1945_v6 = vadd.f32 %v1940_v5, %v3180_v47  ;;  %v2382_v9 = vpop.f32.mrb[15].mxu1  ;;  %v108_v47 = vld [vmem:[#allocation10 + $0x48] sm:$0xff] }
0x1df2   :  { %v2459_v57 = vpack.c.bf16 %v108_v47, %v107_v25 }
0x1df3   :  { %v1949_v10 = vsel %vm117_vm0, %v1945_v6, 0.0 }
0x1df4   :  { %1950 = vadd.xlane.f32.xlu0 %v1949_v10  ;;  %2460 = vmatpush3.bf16.msra.mxu0 %v2459_v57 }
0x1df5   :  { %2461 = vmatprep.subr.bf16.mxu0 %v2773_v17  ;;  %v1981_v17 = vrot.slane %v3162_v43, %v1469_v39  ;;  %v2633_v39 = vld [vmem:[%s3271_s2] sm:$0x3]  ;;  %s2778_s2 = smov 96  }
0x1df6   :  { %v2010_v36 = vrot.slane %v2633_v39, %v2927_v38 }
0x1df8   :  { %2463 = vmatpush3.bf16.msra.mxu0 %v2462_v31 }
0x1e7d   :  { %v1948_v11 = vpop.xlane.xlu1 %1947 }
0x1e7e   :  { %v1952_v12 = vmul.f32 0.03125, %v1948_v11 }
0x1e80   :  { %v1954_v27 = vsub.f32 %v1944_v0, %v1952_v12 }
0x1e81   :  { %v1951_v13 = vpop.xlane.xlu0 %1950 }
0x1e82   :  { %v1953_v14 = vmul.f32 0.03125, %v1951_v13  ;;  %v1956_v15 = vmul.f32 %v1954_v27, %v1954_v27 }
0x1e84   :  { %v1955_v16 = vsub.f32 %v1945_v6, %v1953_v14  ;;  %v1958_v50 = vsel %vm117_vm0, %v1956_v15, 0.0 }
0x1e85   :  { %1959 = vadd.xlane.f32.xlu1 %v1958_v50 }
0x1e86   :  { %v1957_v21 = vmul.f32 %v1955_v16, %v1955_v16 }
0x1e88   :  { %v1961_v23 = vsel %vm117_vm0, %v1957_v21, 0.0 }
0x1e89   :  { %1962 = vadd.xlane.f32.xlu0 %v1961_v23 }
0x1f12   :  { %v1960_v41 = vpop.xlane.xlu1 %1959 }
0x1f13   :  { %v1964_v42 = vmul.f32 0.03125, %v1960_v41 }
0x1f15   :  { %v1966_v26 = vadd.f32 1e-05, %v1964_v42 }
0x1f16   :  { %v1963_v44 = vpop.xlane.xlu0 %1962 }
0x1f17   :  { %2626 = vrsqrt.f32 %v1966_v26  ;;  %v1965_v45 = vmul.f32 0.03125, %v1963_v44 }
0x1f19   :  { %v1967_v46 = vadd.f32 1e-05, %v1965_v45  ;;  %v1993_v45 = vrot.slane %v3162_v43, %v1604_v24 }
0x1f1b   :  { %2628 = vrsqrt.f32 %v1967_v46 }
0x1f21   :  { %v2627_v40 = vpop.eup %2626 }
0x1f22   :  { %v1970_v22 = vmul.f32 %v2627_v40, %v1954_v27 }
0x1f24   :  { %v1976_v2 = vmul.f32 %v1975_v33, %v1970_v22  ;;  %v1988_v26 = vmul.f32 %v1987_v55, %v1970_v22 }
0x1f25   :  { %v2629_v3 = vpop.eup %2628 }
0x1f26   :  { %v1982_v49 = vadd.f32 %v1981_v17, %v1976_v2  ;;  %v1971_v35 = vmul.f32 %v2629_v3, %v1955_v16 }
0x1f28   :  { %v1977_v37 = vmul.f32 %v1975_v33, %v1971_v35  ;;  %v2001_v18 = vmul.f32 %v2000_v20, %v1982_v49  ;;  %v1989_v44 = vmul.f32 %v1987_v55, %v1971_v35 }
0x1f2a   :  { %v1983_v32 = vadd.f32 %v1981_v17, %v1977_v37  ;;  %v2002_v8 = vadd.f32 %v2001_v18, %v1997_v19  ;;  %v1994_v17 = vadd.f32 %v1993_v45, %v1988_v26  ;;  %v1995_v2 = vadd.f32 %v1993_v45, %v1989_v44 }
0x1f2c   :  { %v2005_v48 = vmul.f32 %v2004_v7, %v1983_v32 }
0x1f2e   :  { %v2006_v30 = vadd.f32 %v2005_v48, %v2002_v8 }
0x1f30   :  { %2392 = vmatmul.mubr.msk.f32.vlgmr.msra.gmra.mrb[12].mxu0 %vm117_vm0, %v2006_v30 }
0x2003   :  { %v2080_v51 = vpop.f32.mrb[12].mxu0 }
0x2004   :  { %v2081_v52 = vadd.f32 %v2080_v51, %v2010_v36  ;;  %v2393_v53 = vpop.f32.mrb[13].mxu0 }
0x2006   :  { %v2085_v54 = vmul.f32 0.70710677, %v2081_v52  ;;  %v2084_v25 = vmul.f32 0.5, %v2081_v52 }
0x2008   :  { %v2187_v56 = vclamps-f32 %v2085_v54, 3.832507 }
0x200a   :  { %v2088_v58 = vmul.f32 %v2187_v56, %v2187_v56 }
0x200c   :  { %v2098_v59 = vmul.f32 -1.1791603e-07, %v2088_v58  ;;  %v2089_v60 = vmul.f32 0.00022905065, %v2088_v58 }
0x200e   :  { %v2099_v61 = vadd.f32 2.3547966e-05, %v2098_v59  ;;  %v2090_v63 = vadd.f32 0.003408291, %v2089_v60 }
0x2010   :  { %v2100_v62 = vmul.f32 %v2099_v61, %v2088_v58  ;;  %v2091_v4 = vmul.f32 %v2090_v63, %v2088_v58 }
0x2012   :  { %v2101_v0 = vadd.f32 0.0010179626, %v2100_v62  ;;  %v2092_v9 = vadd.f32 0.050955694, %v2091_v4 }
0x2014   :  { %v2102_v1 = vmul.f32 %v2101_v0, %v2088_v58  ;;  %v2093_v38 = vmul.f32 %v2092_v9, %v2088_v58 }
0x2016   :  { %v2103_v5 = vadd.f32 0.01407047, %v2102_v1  ;;  %v2094_v13 = vadd.f32 0.18520832, %v2093_v38 }
0x2018   :  { %v2104_v6 = vmul.f32 %v2103_v5, %v2088_v58  ;;  %v2095_v15 = vmul.f32 %v2094_v13, %v2088_v58 }
0x201a   :  { %v2105_v10 = vadd.f32 0.11098505, %v2104_v6  ;;  %v2096_v16 = vadd.f32 1.1283791, %v2095_v15 }
0x201c   :  { %v2106_v11 = vmul.f32 %v2105_v10, %v2088_v58  ;;  %v2097_v50 = vmul.f32 %v2187_v56, %v2096_v16 }
0x201e   :  { %v2107_v12 = vadd.f32 0.49746925, %v2106_v11 }
0x2020   :  { %v2108_v27 = vmul.f32 %v2107_v12, %v2088_v58 }
0x2022   :  { %v2109_v14 = vadd.f32 1.0, %v2108_v27 }
0x2024   :  { %2630 = vrcp.f32 %v2109_v14 }
0x202e   :  { %v2631_v21 = vpop.eup %2630 }
0x202f   :  { %v2111_v23 = vmul.f32 %v2631_v21, %v2097_v50 }
0x2031   :  { %v2112_v47 = vadd.f32 1.0, %v2111_v23 }
0x2033   :  { %v2113_v57 = vmul.f32 %v2112_v47, %v2084_v25 }
0x2035   :  { %2119 = vrot.lane.b32.xlu0 %v2113_v57, %s2776_s30  ;;  %2115 = vrot.lane.b32.xlu1 %v2113_v57, %s2778_s2 }
0x2039   :  { %2123 = vrot.lane.b32.xlu1 %v2113_v57, %s2777_s10 }
0x20a7   :  { %v2116_v29 = vpop.permute.xlu1 %2115  ;;  %v2120_v41 = vpop.permute.xlu0 %2119 }
0x20a8   :  { %v2118_v31 = vadd.f32 %v2116_v29, %v2113_v57 }
0x20aa   :  { %v2122_v42 = vadd.f32 %v2120_v41, %v2118_v31 }
0x20ab   :  { %v2124_v46 = vpop.permute.xlu1 %2123 }
0x20ac   :  { %v2126_v33 = vadd.f32 %v2124_v46, %v2122_v42 }
0x20ae   :  { %v2127_v40 = vadd.f32 %v2126_v33, %v2006_v30 }
0x20b0   :  { %v2128_v3 = vadd.f32 %v2127_v40, %v1994_v17  ;;  %v2129_v20 = vadd.f32 %v2127_v40, %v1995_v2 }
0x20b2   :  { %2130 = vst.msk [vmem:[#allocation14] sm:$0xff] %vm117_vm0, %v2128_v3  ;;  %2131 = vst.msk [vmem:[#allocation14 + $0x8] sm:$0xff] %vm117_vm0, %v2129_v20 }
0x20b3   :  { %2745 = shalt.err (!%p2742_p13)
}
0x20b4   :  { %s2746_s21 = scalar_lea.hbm %s3276_s7, 256 }
0x20b5   :  { %p2747_p0 = scmp.ne.s32.totalorder %s3276_s7, %s2746_s21  ;;  %p2750_p1 = scmp.lt.u32.totalorder %s2746_s21, %s3276_s7 }
0x20b7   :  { %p2752_p2 = pnand %p2750_p1, %p2747_p0 }
0x20b9   :  { %2755 = shalt.err (!%p2752_p2)
}
0x20ba   :  { %2143 = dma.vmem_to_hbm [thread:$0]  %s2138_s17, 256, %s3276_s7, [#allocation6], %s2768_s13, %s2768_s13, %s2769_s14  }
0x20bb   :  { %2764 = dma.done.wait [#allocation6], 256  }
0x20bc   :  { %2765 = vsyncadd [#allocation6], 4294967040 }
0x20bd   :  { %2147 = vsyncpa [#allocation5], 1 }
0x20be   :  { %2148 = vsyncpa [#allocation9], 1 }
0x20bf   :  { %2149 = vsyncpa [#allocation12], 1 }
0x20c0   :  { %2150 = vsyncpa [#allocation6], 1 }
0x20c1   :  { %2151 = vsyncpa [#allocation7], 1 }

</bundles_post_ra>
